<compile_context>
chip_gen: v7x
topology: tpu7x:2x2x1
jax: 0.10.0
libtpu: 0.0.40
codegen_flags: <defaults>
</compile_context>

<pallas_src>
import jax
import jax.numpy as jnp
from jax import lax
from jax.experimental import pallas as pl
from jax.experimental.pallas import tpu as pltpu


def lagnet_kernel(x_ref, w0_ref, b0_ref, wm_ref, bm_ref, wl_ref, bl_ref, o_ref):
    """One batch tile of the subnet forward pass, batch on the lane axis.

    x_ref  : (TB, n_inputs)   f32   input tile, natural torch layout
    w0_ref : (L, n_inputs)    f32   first-layer weight (torch (out, in) layout)
    b0_ref : (L, 1)           f32
    wm_ref : (n_mid, L, L)    f32   middle-layer weights
    bm_ref : (n_mid, L, 1)    f32
    wl_ref : (1, L)           f32   last-layer weight
    bl_ref : (1, 1)           f32   last-layer bias (SMEM scalar)
    o_ref  : (1, TB)          f32   lane-dense output tile
    """
    # First layer + activation. Contract n_inputs of w0 with n_inputs of x:
    # (L, n_in) x (TB, n_in) -> (L, TB).  This keeps x in its natural layout
    # (no wrapper transpose/pad launch); the MXU takes the transposed feed.
    h = jnp.tanh(
        lax.dot_general(
            w0_ref[...],
            x_ref[...],
            dimension_numbers=(((1,), (1,)), ((), ())),
            preferred_element_type=jnp.float32,
        )
        + b0_ref[...]
    )
    # Middle layers + activation. Static Python unroll is fine while n_mid is
    # small (2-4); switch to lax.fori_loop(..., unroll=True) with dynamic
    # wm_ref indexing if the net gets deeper.
    n_mid = wm_ref.shape[0]
    for i in range(n_mid):
        h = jnp.tanh(
            jnp.dot(wm_ref[i], h, preferred_element_type=jnp.float32) + bm_ref[i]
        )
    # Final layer, no activation: (1, L) @ (L, TB) -> (1, TB), lane-dense store.
    o_ref[...] = (
        jnp.dot(wl_ref[...], h, preferred_element_type=jnp.float32) + bl_ref[0, 0]
    )


def _default_num_batch_tiles():
    """One batch tile per TensorCore: 2 on v7x (megacore), 1 on v5e/v6e."""
    try:
        kind = jax.devices()[0].device_kind.lower()
    except Exception:
        return 1
    return 2 if "v7" in kind else 1


def lagnet_forward(x, w0, b0, wm, bm, wl, bl, *, num_batch_tiles=None):
    """LAGNET forward. x: (B, n_inputs) f32 -> (1, B) f32 (lane-dense layout).

    The result is the torch output transposed; transpose/reshape downstream if
    the (B, 1) torch layout is required (kept off this hot path on purpose).
    """
    B, n_inputs = x.shape
    L = w0.shape[0]
    n_mid = wm.shape[0]

    if num_batch_tiles is None:
        num_batch_tiles = _default_num_batch_tiles()

    # Tile size: one tile per TensorCore, rounded up to a multiple of 128 so
    # the (1, tb) output store stays lane-dense and the (tb, n_in) input block
    # satisfies the (8, 128) block constraint.  A ragged last block is safe:
    # out-of-range output columns are masked on store and garbage input rows
    # only influence columns that are never written back.
    tb = max(128, pl.cdiv(pl.cdiv(B, num_batch_tiles), 128) * 128)
    grid = (pl.cdiv(B, tb),)

    flops = 2 * B * (n_inputs * L + n_mid * L * L + L)
    transcendentals = (n_mid + 1) * B * L
    bytes_accessed = 4 * (
        x.size + w0.size + b0.size + wm.size + bm.size + wl.size + bl.size + B
    )

    in_specs = [
        # Activation tile in natural layout: pipelined over the batch grid.
        pl.BlockSpec((tb, n_inputs), lambda i: (i, 0)),
        # Weights / biases: constant index maps -> VMEM-resident across steps.
        pl.BlockSpec((L, n_inputs), lambda i: (0, 0)),
        pl.BlockSpec((L, 1), lambda i: (0, 0)),
        pl.BlockSpec((n_mid, L, L), lambda i: (0, 0, 0)),
        pl.BlockSpec((n_mid, L, 1), lambda i: (0, 0, 0)),
        pl.BlockSpec((1, L), lambda i: (0, 0)),
        # Scalar last-layer bias in SMEM (avoids a padded (8,128) VMEM tile).
        pl.BlockSpec(memory_space=pltpu.MemorySpace.SMEM),
    ]
    out_spec = pl.BlockSpec((1, tb), lambda i: (0, i))

    out_t = pl.pallas_call(
        lagnet_kernel,
        out_shape=jax.ShapeDtypeStruct((1, B), jnp.float32),
        grid_spec=pltpu.PrefetchScalarGridSpec(
            num_scalar_prefetch=0,
            grid=grid,
            in_specs=in_specs,
            out_specs=out_spec,
        ),
        compiler_params=pltpu.CompilerParams(
            dimension_semantics=("parallel",),
        ),
        cost_estimate=pl.CostEstimate(
            flops=int(flops),
            transcendentals=int(transcendentals),
            bytes_accessed=int(bytes_accessed),
        ),
    )(x.astype(jnp.float32), w0, b0, wm, bm, wl, bl)

    return out_t  # (1, B)


def init_lagnet_params(key, n_inputs, n_hidden, layersize):
    """Deterministic init mimicking torch.nn.Linear default (U[-1/sqrt(fan_in), +]).

    Weights are kept in natural torch (out, in) layout; biases as (out, 1).
    """
    assert n_hidden >= 3, "this script assumes at least one middle layer"

    def linear(key, fan_in, fan_out):
        kw, kb = jax.random.split(key)
        bound = 1.0 / jnp.sqrt(jnp.float32(fan_in))
        w = jax.random.uniform(kw, (fan_out, fan_in), jnp.float32, -bound, bound)
        b = jax.random.uniform(kb, (fan_out, 1), jnp.float32, -bound, bound)
        return w, b

    keys = jax.random.split(key, n_hidden)
    # layer 0: n_inputs -> layersize
    w0, b0 = linear(keys[0], n_inputs, layersize)
    # middle layers 1..n_hidden-2: layersize -> layersize
    wms, bms = [], []
    for i in range(1, n_hidden - 1):
        w, b = linear(keys[i], layersize, layersize)
        wms.append(w)
        bms.append(b)
    wm = jnp.stack(wms, axis=0)  # (n_mid, L, L)
    bm = jnp.stack(bms, axis=0)  # (n_mid, L, 1)
    # last layer: layersize -> 1
    wl, bl = linear(keys[n_hidden - 1], layersize, 1)  # (1, L), (1, 1)
    return w0, b0, wm, bm, wl, bl


def lagnet_reference(x, w0, b0, wm, bm, wl, bl):
    """Plain-JAX reference of the same forward pass (torch layout weights)."""
    h = jnp.tanh(x @ w0.T + b0[:, 0])
    for i in range(wm.shape[0]):
        h = jnp.tanh(h @ wm[i].T + bm[i, :, 0])
    return h @ wl.T + bl[0, 0]  # (B, 1), torch layout


if __name__ == "__main__":
    # Small shapes implied by the module: a subnet mapping n_inputs lags -> 1.
    B = 2048        # batch of lag vectors
    n_inputs = 4
    layersize = 32
    n_hidden = 4    # layers: (4->32), (32->32), (32->32), (32->1)

    key = jax.random.PRNGKey(0)
    kx, kp = jax.random.split(key)
    x = jax.random.normal(kx, (B, n_inputs), jnp.float32)

    params = init_lagnet_params(kp, n_inputs, n_hidden, layersize)

    out_t = lagnet_forward(x, *params)           # (1, B), lane-dense layout
    out_t = jax.block_until_ready(out_t)

    ref = lagnet_reference(x, *params)           # (B, 1), torch layout
    assert out_t.shape == (1, B), out_t.shape
    # Transpose only for the test-side comparison (kept off the kernel path).
    assert jnp.allclose(out_t[0], ref[:, 0], atol=1e-5, rtol=1e-5), (out_t, ref)

    print("KERNEL_OK")
</pallas_src>

<mosaic_0001>
module attributes {stable_mosaic.version = 11 : i64} {
  func.func @lagnet_kernel(%arg0: i32, %arg1: memref<2048x4xf32, #tpu.memory_space<vmem>>, %arg2: memref<32x4xf32, #tpu.memory_space<vmem>>, %arg3: memref<32x1xf32, #tpu.memory_space<vmem>>, %arg4: memref<2x32x32xf32, #tpu.memory_space<vmem>>, %arg5: memref<2x32x1xf32, #tpu.memory_space<vmem>>, %arg6: memref<1x32xf32, #tpu.memory_space<vmem>>, %arg7: memref<1x1xf32, #tpu.memory_space<smem>>, %arg8: memref<1x2048xf32, #tpu.memory_space<vmem>>) attributes {dimension_semantics = [#tpu.dimension_semantics<parallel>], iteration_bounds = array<i64: 1>, scalar_prefetch = 0 : i64, scratch_operands = 0 : i64, tpu.core_type = #tpu.core_type<tc>, window_params = [{transform_indices = @transform_0, window_bounds = array<i64: 2048, 4>}, {pipeline_mode = #tpu.pipeline_mode<synchronous>, transform_indices = @transform_1, window_bounds = array<i64: 32, 4>}, {pipeline_mode = #tpu.pipeline_mode<synchronous>, transform_indices = @transform_2, window_bounds = array<i64: 32, 1>}, {pipeline_mode = #tpu.pipeline_mode<synchronous>, transform_indices = @transform_3, window_bounds = array<i64: 2, 32, 32>}, {pipeline_mode = #tpu.pipeline_mode<synchronous>, transform_indices = @transform_4, window_bounds = array<i64: 2, 32, 1>}, {pipeline_mode = #tpu.pipeline_mode<synchronous>, transform_indices = @transform_5, window_bounds = array<i64: 1, 32>}, {transform_indices = @transform_6, window_bounds = array<i64: 1, 1>}, {transform_indices = @transform_7, window_bounds = array<i64: 1, 2048>}]} {
    %c0 = arith.constant 0 : index
    %c0_0 = arith.constant 0 : index
    %0 = vector.load %arg2[%c0, %c0_0] : memref<32x4xf32, #tpu.memory_space<vmem>>, vector<32x4xf32>
    %c0_1 = arith.constant 0 : index
    %c0_2 = arith.constant 0 : index
    %1 = vector.load %arg1[%c0_1, %c0_2] : memref<2048x4xf32, #tpu.memory_space<vmem>>, vector<2048x4xf32>
    %cst = arith.constant dense<0.000000e+00> : vector<32x2048xf32>
    %2 = tpu.matmul %0, %1, %cst {dimension_numbers = #tpu.dot_dimension_numbers<[1], [1], [0], [0], [0, 0, 1, 0], [], []>} : vector<32x4xf32>, vector<2048x4xf32>, vector<32x2048xf32> -> vector<32x2048xf32>
    %c0_3 = arith.constant 0 : index
    %c0_4 = arith.constant 0 : index
    %3 = vector.load %arg3[%c0_3, %c0_4] : memref<32x1xf32, #tpu.memory_space<vmem>>, vector<32x1xf32>
    %4 = vector.broadcast %3 : vector<32x1xf32> to vector<32x2048xf32>
    %5 = arith.addf %2, %4 : vector<32x2048xf32>
    %6 = math.tanh %5 : vector<32x2048xf32>
    %c0_5 = arith.constant 0 : index
    %c0_6 = arith.constant 0 : index
    %c0_7 = arith.constant 0 : index
    %7 = vector.load %arg4[%c0_5, %c0_6, %c0_7] : memref<2x32x32xf32, #tpu.memory_space<vmem>>, vector<1x32x32xf32>
    %8 = vector.shape_cast %7 : vector<1x32x32xf32> to vector<32x32xf32>
    %cst_8 = arith.constant dense<0.000000e+00> : vector<32x2048xf32>
    %9 = tpu.matmul %8, %6, %cst_8 {dimension_numbers = #tpu.dot_dimension_numbers<[1], [0], [0], [1], [0, 0, 1, 1], [], []>} : vector<32x32xf32>, vector<32x2048xf32>, vector<32x2048xf32> -> vector<32x2048xf32>
    %c0_9 = arith.constant 0 : index
    %c0_10 = arith.constant 0 : index
    %c0_11 = arith.constant 0 : index
    %10 = vector.load %arg5[%c0_9, %c0_10, %c0_11] : memref<2x32x1xf32, #tpu.memory_space<vmem>>, vector<1x32x1xf32>
    %11 = vector.shape_cast %10 : vector<1x32x1xf32> to vector<32x1xf32>
    %12 = vector.broadcast %11 : vector<32x1xf32> to vector<32x2048xf32>
    %13 = arith.addf %9, %12 : vector<32x2048xf32>
    %14 = math.tanh %13 : vector<32x2048xf32>
    %c1 = arith.constant 1 : index
    %c0_12 = arith.constant 0 : index
    %c0_13 = arith.constant 0 : index
    %15 = vector.load %arg4[%c1, %c0_12, %c0_13] : memref<2x32x32xf32, #tpu.memory_space<vmem>>, vector<1x32x32xf32>
    %16 = vector.shape_cast %15 : vector<1x32x32xf32> to vector<32x32xf32>
    %cst_14 = arith.constant dense<0.000000e+00> : vector<32x2048xf32>
    %17 = tpu.matmul %16, %14, %cst_14 {dimension_numbers = #tpu.dot_dimension_numbers<[1], [0], [0], [1], [0, 0, 1, 1], [], []>} : vector<32x32xf32>, vector<32x2048xf32>, vector<32x2048xf32> -> vector<32x2048xf32>
    %c1_15 = arith.constant 1 : index
    %c0_16 = arith.constant 0 : index
    %c0_17 = arith.constant 0 : index
    %18 = vector.load %arg5[%c1_15, %c0_16, %c0_17] : memref<2x32x1xf32, #tpu.memory_space<vmem>>, vector<1x32x1xf32>
    %19 = vector.shape_cast %18 : vector<1x32x1xf32> to vector<32x1xf32>
    %20 = vector.broadcast %19 : vector<32x1xf32> to vector<32x2048xf32>
    %21 = arith.addf %17, %20 : vector<32x2048xf32>
    %22 = math.tanh %21 : vector<32x2048xf32>
    %c0_18 = arith.constant 0 : index
    %c0_19 = arith.constant 0 : index
    %23 = vector.load %arg6[%c0_18, %c0_19] : memref<1x32xf32, #tpu.memory_space<vmem>>, vector<1x32xf32>
    %cst_20 = arith.constant dense<0.000000e+00> : vector<1x2048xf32>
    %24 = tpu.matmul %23, %22, %cst_20 {dimension_numbers = #tpu.dot_dimension_numbers<[1], [0], [0], [1], [0, 0, 1, 1], [], []>} : vector<1x32xf32>, vector<32x2048xf32>, vector<1x2048xf32> -> vector<1x2048xf32>
    %c0_21 = arith.constant 0 : index
    %c0_22 = arith.constant 0 : index
    %25 = memref.load %arg7[%c0_21, %c0_22] : memref<1x1xf32, #tpu.memory_space<smem>>
    %26 = vector.broadcast %25 : f32 to vector<1x2048xf32>
    %27 = arith.addf %24, %26 : vector<1x2048xf32>
    %c0_23 = arith.constant 0 : index
    %c0_24 = arith.constant 0 : index
    %28 = vector.load %arg8[%c0_23, %c0_24] : memref<1x2048xf32, #tpu.memory_space<vmem>>, vector<1x2048xf32>
    tpu.vector_store %arg8[%c0_23, %c0_24], %27 {strides = array<i32>} : memref<1x2048xf32, #tpu.memory_space<vmem>>, vector<1x2048xf32>,
    return
  }
  func.func @transform_0(%arg0: i32) -> (i32, i32) {
    %c0_i32 = arith.constant 0 : i32
    %c0_i32_0 = arith.constant 0 : i32
    return %arg0, %c0_i32 : i32, i32
  }
  func.func @transform_1(%arg0: i32) -> (i32, i32) {
    %c0_i32 = arith.constant 0 : i32
    %c0_i32_0 = arith.constant 0 : i32
    %c0_i32_1 = arith.constant 0 : i32
    return %c0_i32, %c0_i32_0 : i32, i32
  }
  func.func @transform_2(%arg0: i32) -> (i32, i32) {
    %c0_i32 = arith.constant 0 : i32
    %c0_i32_0 = arith.constant 0 : i32
    %c0_i32_1 = arith.constant 0 : i32
    return %c0_i32, %c0_i32_0 : i32, i32
  }
  func.func @transform_3(%arg0: i32) -> (i32, i32, i32) {
    %c0_i32 = arith.constant 0 : i32
    %c0_i32_0 = arith.constant 0 : i32
    %c0_i32_1 = arith.constant 0 : i32
    %c0_i32_2 = arith.constant 0 : i32
    return %c0_i32, %c0_i32_0, %c0_i32_1 : i32, i32, i32
  }
  func.func @transform_4(%arg0: i32) -> (i32, i32, i32) {
    %c0_i32 = arith.constant 0 : i32
    %c0_i32_0 = arith.constant 0 : i32
    %c0_i32_1 = arith.constant 0 : i32
    %c0_i32_2 = arith.constant 0 : i32
    return %c0_i32, %c0_i32_0, %c0_i32_1 : i32, i32, i32
  }
  func.func @transform_5(%arg0: i32) -> (i32, i32) {
    %c0_i32 = arith.constant 0 : i32
    %c0_i32_0 = arith.constant 0 : i32
    %c0_i32_1 = arith.constant 0 : i32
    return %c0_i32, %c0_i32_0 : i32, i32
  }
  func.func @transform_6(%arg0: i32) -> (i32, i32) {
    %c0_i32 = arith.constant 0 : i32
    %c0_i32_0 = arith.constant 0 : i32
    %c0_i32_1 = arith.constant 0 : i32
    return %c0_i32, %c0_i32_0 : i32, i32
  }
  func.func @transform_7(%arg0: i32) -> (i32, i32) {
    %c0_i32 = arith.constant 0 : i32
    %c0_i32_0 = arith.constant 0 : i32
    return %c0_i32, %arg0 : i32, i32
  }
}

</mosaic_0001>

<bundles_post_ra>
// kernel: tpu_custom_call.1
= control target key start
LH: loop header
LB: loop body
LE: loop exit
PB: predicated region body
PF: predicated region fallthrough
CT: control target
= control target key end

     0   :  { %vm312_vm0 = vcmask 31744   ;;  %v5889_v52 = vmov 0   ;;  %s7640_s0 = inlined_call_operand.vmem [shape: f32[2048,4], index: 0, kind: input, shape index: {}]   ;;  %s7641_s1 = inlined_call_operand.vmem [shape: f32[32,4], index: 1, kind: input, shape index: {}]   ;;  %s7642_s2 = inlined_call_operand.vmem [shape: f32[32,1], index: 2, kind: input, shape index: {}]   ;;  %s7643_s3 = inlined_call_operand.vmem [shape: f32[2,32,32], index: 3, kind: input, shape index: {}]   ;;  %s7644_s4 = inlined_call_operand.vmem [shape: f32[2,32,1], index: 4, kind: input, shape index: {}]   ;;  %s7645_s5 = inlined_call_operand.vmem [shape: f32[1,32], index: 5, kind: input, shape index: {}]   ;;  %s7646_s6 = inlined_call_operand.<no memory space> [shape: f32[1,1], index: 6, kind: input, shape index: {}]   ;;  %s7647_s7 = inlined_call_operand.hbm [shape: f32[1,2048], index: 7, kind: output, shape index: {}]  }
   0x1   :  { %v48_v0 = vld [vmem:[%s7640_s0 + $0x80] sm:$0xff]  ;;  %v49_v1 = vld [vmem:[%s7640_s0 + $0x88] sm:$0xff]  ;;  %vm5944_vm1 = vmpackc.low %vm312_vm0, %vm312_vm0  ;;  %5478 = vset.pattern.permute.xlu0 %v5889_v52  ;;  %5479 = vset.pattern.permute.xlu1 %v5889_v52 }
   0x2   :  { %v80_v2 = vld [vmem:[%s7640_s0 + $0x180] sm:$0xff]  ;;  %v4898_v3 = vpack.c.bf16 %v49_v1, %v48_v0  ;;  %v81_v5 = vld [vmem:[%s7640_s0 + $0x188] sm:$0xff]  ;;  %v50_v13 = vld [vmem:[%s7640_s0 + $0x90] sm:$0xff] }
   0x3   :  { %v32_v6 = vld [vmem:[%s7640_s0] sm:$0xff]  ;;  %v4946_v7 = vpack.c.bf16 %v81_v5, %v80_v2  ;;  %v33_v8 = vld [vmem:[%s7640_s0 + $0x8] sm:$0xff]  ;;  %v51_v14 = vld [vmem:[%s7640_s0 + $0x98] sm:$0xff] }
   0x4   :  { %v64_v9 = vld [vmem:[%s7640_s0 + $0x100] sm:$0xff]  ;;  %v65_v10 = vld [vmem:[%s7640_s0 + $0x108] sm:$0xff]  ;;  %4900 = vmatprep.subr.msk.bf16.mxu0 %vm5944_vm1, %v4898_v3  ;;  %v4901_v11 = vpack.c.bf16 %v33_v8, %v32_v6  ;;  %v82_v15 = vld [vmem:[%s7640_s0 + $0x190] sm:$0xff]  ;;  %v4904_v16 = vpack.c.bf16 %v51_v14, %v50_v13 }
   0x5   :  { %v4949_v12 = vpack.c.bf16 %v65_v10, %v64_v9  ;;  %4948 = vmatprep.subr.msk.bf16.mxu1 %vm5944_vm1, %v4946_v7  ;;  %v83_v17 = vld [vmem:[%s7640_s0 + $0x198] sm:$0xff]  ;;  %v34_v19 = vld [vmem:[%s7640_s0 + $0x10] sm:$0xff]  ;;  %v52_v23 = vld [vmem:[%s7640_s0 + $0xa0] sm:$0xff] }
   0x6   :  { %4903 = vmatpush3.bf16.xpose.msk.msra.mxu0 %vm5944_vm1, %v4901_v11  ;;  %v4952_v18 = vpack.c.bf16 %v83_v17, %v82_v15  ;;  %v35_v20 = vld [vmem:[%s7640_s0 + $0x18] sm:$0xff]  ;;  %v66_v21 = vld [vmem:[%s7640_s0 + $0x110] sm:$0xff]  ;;  %v53_v24 = vld [vmem:[%s7640_s0 + $0xa8] sm:$0xff] }
   0x7   :  { %4951 = vmatpush3.bf16.xpose.msk.msra.mxu1 %vm5944_vm1, %v4949_v12  ;;  %4906 = vmatprep.subr.msk.bf16.mxu0 %vm5944_vm1, %v4904_v16  ;;  %v67_v22 = vld [vmem:[%s7640_s0 + $0x118] sm:$0xff]  ;;  %v84_v25 = vld [vmem:[%s7640_s0 + $0x1a0] sm:$0xff]  ;;  %v85_v26 = vld [vmem:[%s7640_s0 + $0x1a8] sm:$0xff]  ;;  %v4907_v27 = vpack.c.bf16 %v35_v20, %v34_v19  ;;  %v4910_v29 = vpack.c.bf16 %v53_v24, %v52_v23 }
   0x8   :  { %4954 = vmatprep.subr.msk.bf16.mxu1 %vm5944_vm1, %v4952_v18  ;;  %v4955_v28 = vpack.c.bf16 %v67_v22, %v66_v21  ;;  %v4958_v30 = vpack.c.bf16 %v85_v26, %v84_v25  ;;  %v36_v31 = vld [vmem:[%s7640_s0 + $0x20] sm:$0xff]  ;;  %v37_v32 = vld [vmem:[%s7640_s0 + $0x28] sm:$0xff]  ;;  %v54_v35 = vld [vmem:[%s7640_s0 + $0xb0] sm:$0xff] }
   0x9   :  { %v68_v33 = vld [vmem:[%s7640_s0 + $0x120] sm:$0xff]  ;;  %v69_v34 = vld [vmem:[%s7640_s0 + $0x128] sm:$0xff]  ;;  %v55_v36 = vld [vmem:[%s7640_s0 + $0xb8] sm:$0xff]  ;;  %v4913_v39 = vpack.c.bf16 %v37_v32, %v36_v31 }
   0xa   :  { %v86_v37 = vld [vmem:[%s7640_s0 + $0x1b0] sm:$0xff]  ;;  %v87_v38 = vld [vmem:[%s7640_s0 + $0x1b8] sm:$0xff]  ;;  %v4961_v40 = vpack.c.bf16 %v69_v34, %v68_v33  ;;  %v4916_v41 = vpack.c.bf16 %v55_v36, %v54_v35  ;;  %v6056_v45 = vld [vmem:[%s7641_s1] sm:$0xff] }
   0xb   :  { %v4964_v42 = vpack.c.bf16 %v87_v38, %v86_v37  ;;  %v38_v43 = vld [vmem:[%s7640_s0 + $0x30] sm:$0xff]  ;;  %v39_v44 = vld [vmem:[%s7640_s0 + $0x38] sm:$0xff]  ;;  %v56_v48 = vld [vmem:[%s7640_s0 + $0xc0] sm:$0xff]  ;;  %4610 = vmatprep.mubr.msk.f32.mxu0 %vm312_vm0, %v6056_v45  ;;  %4650 = vmatprep.mubr.msk.f32.mxu1 %vm312_vm0, %v6056_v45 }
   0xc   :  { %v70_v46 = vld [vmem:[%s7640_s0 + $0x130] sm:$0xff]  ;;  %v71_v47 = vld [vmem:[%s7640_s0 + $0x138] sm:$0xff]  ;;  %v57_v49 = vld [vmem:[%s7640_s0 + $0xc8] sm:$0xff]  ;;  %v4919_v53 = vpack.c.bf16 %v39_v44, %v38_v43 }
   0xd   :  { %v88_v50 = vld [vmem:[%s7640_s0 + $0x1c0] sm:$0xff]  ;;  %v89_v51 = vld [vmem:[%s7640_s0 + $0x1c8] sm:$0xff]  ;;  %v4967_v54 = vpack.c.bf16 %v71_v47, %v70_v46  ;;  %v4922_v55 = vpack.c.bf16 %v57_v49, %v56_v48  ;;  %v58_v61 = vld [vmem:[%s7640_s0 + $0xd0] sm:$0xff] }
   0xe   :  { %4909 = vmatpush3.bf16.xpose.msk.msra.mxu0 %vm5944_vm1, %v4907_v27  ;;  %v4970_v56 = vpack.c.bf16 %v89_v51, %v88_v50  ;;  %v40_v57 = vld [vmem:[%s7640_s0 + $0x40] sm:$0xff]  ;;  %v41_v58 = vld [vmem:[%s7640_s0 + $0x48] sm:$0xff]  ;;  %v59_v62 = vld [vmem:[%s7640_s0 + $0xd8] sm:$0xff] }
   0xf   :  { %4957 = vmatpush3.bf16.xpose.msk.msra.mxu1 %vm5944_vm1, %v4955_v28  ;;  %4912 = vmatprep.subr.msk.bf16.mxu0 %vm5944_vm1, %v4910_v29  ;;  %v72_v59 = vld [vmem:[%s7640_s0 + $0x140] sm:$0xff]  ;;  %v73_v60 = vld [vmem:[%s7640_s0 + $0x148] sm:$0xff]  ;;  %v90_v63 = vld [vmem:[%s7640_s0 + $0x1d0] sm:$0xff]  ;;  %v4925_v1 = vpack.c.bf16 %v41_v58, %v40_v57  ;;  %v4928_v3 = vpack.c.bf16 %v59_v62, %v58_v61 }
  0x10   :  { %4960 = vmatprep.subr.msk.bf16.mxu1 %vm5944_vm1, %v4958_v30  ;;  %v91_v0 = vld [vmem:[%s7640_s0 + $0x1d8] sm:$0xff]  ;;  %v4973_v2 = vpack.c.bf16 %v73_v60, %v72_v59  ;;  %v42_v6 = vld [vmem:[%s7640_s0 + $0x50] sm:$0xff]  ;;  %v60_v10 = vld [vmem:[%s7640_s0 + $0xe0] sm:$0xff] }
  0x11   :  { %v4976_v5 = vpack.c.bf16 %v91_v0, %v90_v63  ;;  %v43_v7 = vld [vmem:[%s7640_s0 + $0x58] sm:$0xff]  ;;  %v74_v8 = vld [vmem:[%s7640_s0 + $0x150] sm:$0xff]  ;;  %v61_v11 = vld [vmem:[%s7640_s0 + $0xe8] sm:$0xff] }
  0x12   :  { %v75_v9 = vld [vmem:[%s7640_s0 + $0x158] sm:$0xff]  ;;  %v92_v12 = vld [vmem:[%s7640_s0 + $0x1e0] sm:$0xff]  ;;  %v93_v13 = vld [vmem:[%s7640_s0 + $0x1e8] sm:$0xff]  ;;  %v4931_v14 = vpack.c.bf16 %v43_v7, %v42_v6  ;;  %v4934_v16 = vpack.c.bf16 %v61_v11, %v60_v10 }
  0x13   :  { %v4979_v15 = vpack.c.bf16 %v75_v9, %v74_v8  ;;  %v4982_v17 = vpack.c.bf16 %v93_v13, %v92_v12  ;;  %v44_v18 = vld [vmem:[%s7640_s0 + $0x60] sm:$0xff]  ;;  %v45_v19 = vld [vmem:[%s7640_s0 + $0x68] sm:$0xff]  ;;  %v62_v22 = vld [vmem:[%s7640_s0 + $0xf0] sm:$0xff] }
  0x14   :  { %v76_v20 = vld [vmem:[%s7640_s0 + $0x160] sm:$0xff]  ;;  %v77_v21 = vld [vmem:[%s7640_s0 + $0x168] sm:$0xff]  ;;  %v63_v23 = vld [vmem:[%s7640_s0 + $0xf8] sm:$0xff]  ;;  %v4937_v26 = vpack.c.bf16 %v45_v19, %v44_v18 }
  0x15   :  { %v94_v24 = vld [vmem:[%s7640_s0 + $0x1f0] sm:$0xff]  ;;  %v95_v25 = vld [vmem:[%s7640_s0 + $0x1f8] sm:$0xff]  ;;  %v4985_v27 = vpack.c.bf16 %v77_v21, %v76_v20  ;;  %v4940_v28 = vpack.c.bf16 %v63_v23, %v62_v22  ;;  %v288_v30 = vld [vmem:[%s7642_s2] sm:$0xff] }
  0x16   :  { %4915 = vmatpush3.bf16.xpose.msk.msra.mxu0 %vm5944_vm1, %v4913_v39  ;;  %v4988_v29 = vpack.c.bf16 %v95_v25, %v94_v24  ;;  %v46_v31 = vld [vmem:[%s7640_s0 + $0x70] sm:$0xff]  ;;  %v47_v32 = vld [vmem:[%s7640_s0 + $0x78] sm:$0xff]  ;;  %v112_v35 = vld [vmem:[%s7640_s0 + $0x280] sm:$0xff]  ;;  %294 = vperm.xlu0 %5478, %v288_v30  }
  0x17   :  { %4963 = vmatpush3.bf16.xpose.msk.msra.mxu1 %vm5944_vm1, %v4961_v40  ;;  %4918 = vmatprep.subr.msk.bf16.mxu0 %vm5944_vm1, %v4916_v41  ;;  %v78_v33 = vld [vmem:[%s7640_s0 + $0x170] sm:$0xff]  ;;  %v79_v34 = vld [vmem:[%s7640_s0 + $0x178] sm:$0xff]  ;;  %v113_v36 = vld [vmem:[%s7640_s0 + $0x288] sm:$0xff]  ;;  %v4943_v41 = vpack.c.bf16 %v47_v32, %v46_v31 }
  0x18   :  { %4966 = vmatprep.subr.msk.bf16.mxu1 %vm5944_vm1, %v4964_v42  ;;  %v144_v37 = vld [vmem:[%s7640_s0 + $0x380] sm:$0xff]  ;;  %v145_v38 = vld [vmem:[%s7640_s0 + $0x388] sm:$0xff]  ;;  %v290_v39 = vld [vmem:[%s7642_s2 + $0x10] sm:$0xff]  ;;  %v4991_v42 = vpack.c.bf16 %v79_v34, %v78_v33  ;;  %v4994_v44 = vpack.c.bf16 %v113_v36, %v112_v35 }
  0x19   :  { %v289_v40 = vld [vmem:[%s7642_s2 + $0x8] sm:$0xff]  ;;  %304 = vperm.xlu1 %5479, %v290_v39   ;;  %v291_v43 = vld [vmem:[%s7642_s2 + $0x18] sm:$0xff]  ;;  %v5042_v46 = vpack.c.bf16 %v145_v38, %v144_v37  ;;  %v96_v47 = vld [vmem:[%s7640_s0 + $0x200] sm:$0xff] }
  0x1a   :  { %299 = vperm.xlu0 %5478, %v289_v40   ;;  %v97_v48 = vld [vmem:[%s7640_s0 + $0x208] sm:$0xff]  ;;  %v128_v49 = vld [vmem:[%s7640_s0 + $0x300] sm:$0xff]  ;;  %v114_v51 = vld [vmem:[%s7640_s0 + $0x290] sm:$0xff] }
  0x1b   :  { %v129_v50 = vld [vmem:[%s7640_s0 + $0x308] sm:$0xff]  ;;  %v115_v52 = vld [vmem:[%s7640_s0 + $0x298] sm:$0xff]  ;;  %v6272_v60 = vld [vmem:[%s7641_s1 + $0x10] sm:$0xff] }
  0x1c   :  { %v6259_v57 = vld [vmem:[%s7641_s1 + $0x8] sm:$0xff]  ;;  %v5000_v58 = vpack.c.bf16 %v115_v52, %v114_v51  ;;  %v98_v61 = vld [vmem:[%s7640_s0 + $0x210] sm:$0xff] }
  0x1d   :  { %309 = vperm.xlu1 %5479, %v291_v43  }
  0x1e   :  { %4921 = vmatpush3.bf16.xpose.msk.msra.mxu0 %vm5944_vm1, %v4919_v53  ;;  %v146_v53 = vld [vmem:[%s7640_s0 + $0x390] sm:$0xff] }
  0x1f   :  { %4969 = vmatpush3.bf16.xpose.msk.msra.mxu1 %vm5944_vm1, %v4967_v54  ;;  %4924 = vmatprep.subr.msk.bf16.mxu0 %vm5944_vm1, %v4922_v55  ;;  %v147_v54 = vld [vmem:[%s7640_s0 + $0x398] sm:$0xff]  ;;  %v4997_v55 = vpack.c.bf16 %v97_v48, %v96_v47 }
  0x20   :  { %4972 = vmatprep.subr.msk.bf16.mxu1 %vm5944_vm1, %v4970_v56  ;;  %v5045_v56 = vpack.c.bf16 %v129_v50, %v128_v49  ;;  %v5048_v59 = vpack.c.bf16 %v147_v54, %v146_v53 }
  0x26   :  { %4927 = vmatpush3.bf16.xpose.msk.msra.mxu0 %vm5944_vm1, %v4925_v1 }
  0x27   :  { %4975 = vmatpush3.bf16.xpose.msk.msra.mxu1 %vm5944_vm1, %v4973_v2  ;;  %4930 = vmatprep.subr.msk.bf16.mxu0 %vm5944_vm1, %v4928_v3 }
  0x28   :  { %4978 = vmatprep.subr.msk.bf16.mxu1 %vm5944_vm1, %v4976_v5 }
  0x2e   :  { %4933 = vmatpush3.bf16.xpose.msk.msra.mxu0 %vm5944_vm1, %v4931_v14 }
  0x2f   :  { %4981 = vmatpush3.bf16.xpose.msk.msra.mxu1 %vm5944_vm1, %v4979_v15  ;;  %4936 = vmatprep.subr.msk.bf16.mxu0 %vm5944_vm1, %v4934_v16 }
  0x30   :  { %4984 = vmatprep.subr.msk.bf16.mxu1 %vm5944_vm1, %v4982_v17 }
  0x36   :  { %4939 = vmatpush3.bf16.xpose.msk.msra.mxu0 %vm5944_vm1, %v4937_v26 }
  0x37   :  { %4987 = vmatpush3.bf16.xpose.msk.msra.mxu1 %vm5944_vm1, %v4985_v27  ;;  %4942 = vmatprep.subr.msk.bf16.mxu0 %vm5944_vm1, %v4940_v28 }
  0x38   :  { %4990 = vmatprep.subr.msk.bf16.mxu1 %vm5944_vm1, %v4988_v29 }
  0x3e   :  { %4945 = vmatpush3.bf16.xpose.msk.msra.mxu0 %vm5944_vm1, %v4943_v41 }
  0x3f   :  { %4993 = vmatpush3.bf16.xpose.msk.msra.mxu1 %vm5944_vm1, %v4991_v42  ;;  %4996 = vmatprep.subr.msk.bf16.mxu0 %vm5944_vm1, %v4994_v44 }
  0x40   :  { %5044 = vmatprep.subr.msk.bf16.mxu1 %vm5944_vm1, %v5042_v46 }
  0x45   :  { %4611 = vmatmul.mubr.msk.f32.vlgmr.msra.gmra.mrb[0].mxu0 %vm312_vm0, %v6056_v45 }
  0x46   :  { %4651 = vmatmul.mubr.msk.f32.vlgmr.msra.gmra.mrb[0].mxu1 %vm312_vm0, %v6056_v45  ;;  %4999 = vmatpush3.bf16.xpose.msk.msra.mxu0 %vm5944_vm1, %v4997_v55 }
  0x47   :  { %5047 = vmatpush3.bf16.xpose.msk.msra.mxu1 %vm5944_vm1, %v5045_v56 }
  0x48   :  { %13 = vsyncpa [#allocation4], 0  ;;  %4612 = vmatprep.mubr.msk.f32.mxu0 %vm312_vm0, %v6259_v57  ;;  %4652 = vmatprep.mubr.msk.f32.mxu1 %vm312_vm0, %v6259_v57  ;;  %v99_v62 = vld [vmem:[%s7640_s0 + $0x218] sm:$0xff]  ;;  %v130_v63 = vld [vmem:[%s7640_s0 + $0x310] sm:$0xff]  ;;  %v5890_v4 = vmov 0.0   ;;  %vm1897_vm2 = vcmask 261120  }
  0x49   :  { %v131_v0 = vld [vmem:[%s7640_s0 + $0x318] sm:$0xff]  ;;  %5002 = vmatprep.subr.msk.bf16.mxu0 %vm5944_vm1, %v5000_v58  ;;  %5050 = vmatprep.subr.msk.bf16.mxu1 %vm5944_vm1, %v5048_v59  ;;  %v116_v1 = vld [vmem:[%s7640_s0 + $0x2a0] sm:$0xff]  ;;  %v117_v2 = vld [vmem:[%s7640_s0 + $0x2a8] sm:$0xff]  ;;  %v5003_v6 = vpack.c.bf16 %v99_v62, %v98_v61 }
  0x4a   :  { %4613 = vmatmul.mubr.msk.f32.gmra.mrb[2].mxu0 %vm312_vm0, %v6259_v57  ;;  %4653 = vmatmul.mubr.msk.f32.gmra.mrb[2].mxu1 %vm312_vm0, %v6259_v57  ;;  %v148_v3 = vld [vmem:[%s7640_s0 + $0x3a0] sm:$0xff]  ;;  %v149_v5 = vld [vmem:[%s7640_s0 + $0x3a8] sm:$0xff]  ;;  %v5051_v7 = vpack.c.bf16 %v131_v0, %v130_v63  ;;  %v6317_v8 = vld [vmem:[%s7641_s1 + $0x18] sm:$0xff]  ;;  %v5006_v9 = vpack.c.bf16 %v117_v2, %v116_v1 }
  0x4b   :  { %4614 = vmatprep.mubr.msk.f32.mxu0 %vm312_vm0, %v6272_v60  ;;  %4654 = vmatprep.mubr.msk.f32.mxu1 %vm312_vm0, %v6272_v60  ;;  %v5054_v10 = vpack.c.bf16 %v149_v5, %v148_v3  ;;  %v100_v11 = vld [vmem:[%s7640_s0 + $0x220] sm:$0xff]  ;;  %v101_v12 = vld [vmem:[%s7640_s0 + $0x228] sm:$0xff]  ;;  %v118_v15 = vld [vmem:[%s7640_s0 + $0x2b0] sm:$0xff] }
  0x4c   :  { %v132_v13 = vld [vmem:[%s7640_s0 + $0x320] sm:$0xff]  ;;  %v133_v14 = vld [vmem:[%s7640_s0 + $0x328] sm:$0xff]  ;;  %v119_v16 = vld [vmem:[%s7640_s0 + $0x2b8] sm:$0xff]  ;;  %v5009_v19 = vpack.c.bf16 %v101_v12, %v100_v11 }
  0x4d   :  { %v150_v17 = vld [vmem:[%s7640_s0 + $0x3b0] sm:$0xff]  ;;  %v151_v18 = vld [vmem:[%s7640_s0 + $0x3b8] sm:$0xff]  ;;  %v5057_v20 = vpack.c.bf16 %v133_v14, %v132_v13  ;;  %v5012_v21 = vpack.c.bf16 %v119_v16, %v118_v15  ;;  %v120_v27 = vld [vmem:[%s7640_s0 + $0x2c0] sm:$0xff] }
  0x4e   :  { %4615 = vmatmul.mubr.msk.f32.gmra.mrb[4].mxu0 %vm312_vm0, %v6272_v60  ;;  %4655 = vmatmul.mubr.msk.f32.gmra.mrb[4].mxu1 %vm312_vm0, %v6272_v60  ;;  %v5060_v22 = vpack.c.bf16 %v151_v18, %v150_v17  ;;  %v102_v23 = vld [vmem:[%s7640_s0 + $0x230] sm:$0xff]  ;;  %v103_v24 = vld [vmem:[%s7640_s0 + $0x238] sm:$0xff]  ;;  %v121_v28 = vld [vmem:[%s7640_s0 + $0x2c8] sm:$0xff] }
  0x4f   :  { %5005 = vmatpush3.bf16.xpose.msk.msra.mxu0 %vm5944_vm1, %v5003_v6  ;;  %5053 = vmatpush3.bf16.xpose.msk.msra.mxu1 %vm5944_vm1, %v5051_v7  ;;  %v134_v25 = vld [vmem:[%s7640_s0 + $0x330] sm:$0xff]  ;;  %v135_v26 = vld [vmem:[%s7640_s0 + $0x338] sm:$0xff]  ;;  %v152_v29 = vld [vmem:[%s7640_s0 + $0x3c0] sm:$0xff]  ;;  %v5015_v31 = vpack.c.bf16 %v103_v24, %v102_v23  ;;  %v5018_v33 = vpack.c.bf16 %v121_v28, %v120_v27 }
  0x50   :  { %4616 = vmatprep.mubr.msk.f32.mxu0 %vm312_vm0, %v6317_v8  ;;  %4656 = vmatprep.mubr.msk.f32.mxu1 %vm312_vm0, %v6317_v8  ;;  %v153_v30 = vld [vmem:[%s7640_s0 + $0x3c8] sm:$0xff]  ;;  %v5063_v32 = vpack.c.bf16 %v135_v26, %v134_v25  ;;  %v104_v35 = vld [vmem:[%s7640_s0 + $0x240] sm:$0xff]  ;;  %v122_v39 = vld [vmem:[%s7640_s0 + $0x2d0] sm:$0xff] }
  0x51   :  { %5008 = vmatprep.subr.msk.bf16.mxu0 %vm5944_vm1, %v5006_v9  ;;  %5056 = vmatprep.subr.msk.bf16.mxu1 %vm5944_vm1, %v5054_v10  ;;  %v5066_v34 = vpack.c.bf16 %v153_v30, %v152_v29  ;;  %v105_v36 = vld [vmem:[%s7640_s0 + $0x248] sm:$0xff]  ;;  %v136_v37 = vld [vmem:[%s7640_s0 + $0x340] sm:$0xff]  ;;  %v123_v40 = vld [vmem:[%s7640_s0 + $0x2d8] sm:$0xff] }
  0x52   :  { %4617 = vmatmul.mubr.msk.f32.gmra.mrb[6].mxu0 %vm312_vm0, %v6317_v8  ;;  %4657 = vmatmul.mubr.msk.f32.gmra.mrb[6].mxu1 %vm312_vm0, %v6317_v8  ;;  %v137_v38 = vld [vmem:[%s7640_s0 + $0x348] sm:$0xff]  ;;  %v154_v41 = vld [vmem:[%s7640_s0 + $0x3d0] sm:$0xff]  ;;  %v155_v42 = vld [vmem:[%s7640_s0 + $0x3d8] sm:$0xff]  ;;  %v5021_v43 = vpack.c.bf16 %v105_v36, %v104_v35  ;;  %v5024_v46 = vpack.c.bf16 %v123_v40, %v122_v39 }
  0x53   :  { %4690 = vmatprep.mubr.msk.f32.mxu0 %vm312_vm0, %v6056_v45  ;;  %4730 = vmatprep.mubr.msk.f32.mxu1 %vm312_vm0, %v6056_v45  ;;  %v5069_v44 = vpack.c.bf16 %v137_v38, %v136_v37  ;;  %v5072_v47 = vpack.c.bf16 %v155_v42, %v154_v41  ;;  %v106_v48 = vld [vmem:[%s7640_s0 + $0x250] sm:$0xff]  ;;  %v107_v49 = vld [vmem:[%s7640_s0 + $0x258] sm:$0xff]  ;;  %v124_v52 = vld [vmem:[%s7640_s0 + $0x2e0] sm:$0xff] }
  0x54   :  { %v138_v50 = vld [vmem:[%s7640_s0 + $0x350] sm:$0xff]  ;;  %v139_v51 = vld [vmem:[%s7640_s0 + $0x358] sm:$0xff]  ;;  %v125_v53 = vld [vmem:[%s7640_s0 + $0x2e8] sm:$0xff]  ;;  %v5027_v56 = vpack.c.bf16 %v107_v49, %v106_v48 }
  0x55   :  { %v156_v54 = vld [vmem:[%s7640_s0 + $0x3e0] sm:$0xff]  ;;  %v157_v55 = vld [vmem:[%s7640_s0 + $0x3e8] sm:$0xff]  ;;  %v5075_v58 = vpack.c.bf16 %v139_v51, %v138_v50  ;;  %v5030_v59 = vpack.c.bf16 %v125_v53, %v124_v52  ;;  %v126_v2 = vld [vmem:[%s7640_s0 + $0x2f0] sm:$0xff] }
  0x56   :  { %v5078_v61 = vpack.c.bf16 %v157_v55, %v156_v54  ;;  %v108_v62 = vld [vmem:[%s7640_s0 + $0x260] sm:$0xff]  ;;  %v109_v63 = vld [vmem:[%s7640_s0 + $0x268] sm:$0xff]  ;;  %v127_v3 = vld [vmem:[%s7640_s0 + $0x2f8] sm:$0xff] }
  0x57   :  { %5011 = vmatpush3.bf16.xpose.msk.msra.mxu0 %vm5944_vm1, %v5009_v19  ;;  %5059 = vmatpush3.bf16.xpose.msk.msra.mxu1 %vm5944_vm1, %v5057_v20  ;;  %v140_v0 = vld [vmem:[%s7640_s0 + $0x360] sm:$0xff]  ;;  %v141_v1 = vld [vmem:[%s7640_s0 + $0x368] sm:$0xff]  ;;  %v158_v5 = vld [vmem:[%s7640_s0 + $0x3f0] sm:$0xff]  ;;  %v5033_v7 = vpack.c.bf16 %v109_v63, %v108_v62  ;;  %v5036_v10 = vpack.c.bf16 %v127_v3, %v126_v2 }
  0x58   :  { %5014 = vmatprep.subr.msk.bf16.mxu0 %vm5944_vm1, %v5012_v21  ;;  %5062 = vmatprep.subr.msk.bf16.mxu1 %vm5944_vm1, %v5060_v22  ;;  %v159_v6 = vld [vmem:[%s7640_s0 + $0x3f8] sm:$0xff]  ;;  %v5081_v9 = vpack.c.bf16 %v141_v1, %v140_v0  ;;  %v110_v12 = vld [vmem:[%s7640_s0 + $0x270] sm:$0xff]  ;;  %v176_v16 = vld [vmem:[%s7640_s0 + $0x480] sm:$0xff] }
  0x59   :  { %v5084_v11 = vpack.c.bf16 %v159_v6, %v158_v5  ;;  %v111_v13 = vld [vmem:[%s7640_s0 + $0x278] sm:$0xff]  ;;  %v142_v14 = vld [vmem:[%s7640_s0 + $0x370] sm:$0xff]  ;;  %v177_v17 = vld [vmem:[%s7640_s0 + $0x488] sm:$0xff] }
  0x5a   :  { %v143_v15 = vld [vmem:[%s7640_s0 + $0x378] sm:$0xff]  ;;  %v208_v18 = vld [vmem:[%s7640_s0 + $0x580] sm:$0xff]  ;;  %v209_v19 = vld [vmem:[%s7640_s0 + $0x588] sm:$0xff]  ;;  %v5039_v20 = vpack.c.bf16 %v111_v13, %v110_v12  ;;  %v5090_v22 = vpack.c.bf16 %v177_v17, %v176_v16 }
  0x5b   :  { %v5087_v21 = vpack.c.bf16 %v143_v15, %v142_v14  ;;  %v5138_v23 = vpack.c.bf16 %v209_v19, %v208_v18  ;;  %v160_v24 = vld [vmem:[%s7640_s0 + $0x400] sm:$0xff]  ;;  %v161_v25 = vld [vmem:[%s7640_s0 + $0x408] sm:$0xff]  ;;  %v178_v28 = vld [vmem:[%s7640_s0 + $0x490] sm:$0xff] }
  0x5c   :  { %v192_v26 = vld [vmem:[%s7640_s0 + $0x500] sm:$0xff]  ;;  %v193_v27 = vld [vmem:[%s7640_s0 + $0x508] sm:$0xff]  ;;  %v179_v29 = vld [vmem:[%s7640_s0 + $0x498] sm:$0xff] }
  0x5d   :  { %v210_v30 = vld [vmem:[%s7640_s0 + $0x590] sm:$0xff]  ;;  %v163_v37 = vld [vmem:[%s7640_s0 + $0x418] sm:$0xff]  ;;  %v180_v40 = vld [vmem:[%s7640_s0 + $0x4a0] sm:$0xff] }
  0x5e   :  { %v162_v36 = vld [vmem:[%s7640_s0 + $0x410] sm:$0xff]  ;;  %v195_v39 = vld [vmem:[%s7640_s0 + $0x518] sm:$0xff]  ;;  %v181_v41 = vld [vmem:[%s7640_s0 + $0x4a8] sm:$0xff] }
  0x5f   :  { %5017 = vmatpush3.bf16.xpose.msk.msra.mxu0 %vm5944_vm1, %v5015_v31  ;;  %5065 = vmatpush3.bf16.xpose.msk.msra.mxu1 %vm5944_vm1, %v5063_v32  ;;  %v211_v31 = vld [vmem:[%s7640_s0 + $0x598] sm:$0xff]  ;;  %v5093_v32 = vpack.c.bf16 %v161_v25, %v160_v24  ;;  %v194_v38 = vld [vmem:[%s7640_s0 + $0x510] sm:$0xff]  ;;  %v212_v42 = vld [vmem:[%s7640_s0 + $0x5a0] sm:$0xff] }
  0x60   :  { %5020 = vmatprep.subr.msk.bf16.mxu0 %vm5944_vm1, %v5018_v33  ;;  %5068 = vmatprep.subr.msk.bf16.mxu1 %vm5944_vm1, %v5066_v34  ;;  %v5141_v33 = vpack.c.bf16 %v193_v27, %v192_v26  ;;  %v5096_v34 = vpack.c.bf16 %v179_v29, %v178_v28  ;;  %v5144_v35 = vpack.c.bf16 %v211_v31, %v210_v30  ;;  %v164_v49 = vld [vmem:[%s7640_s0 + $0x420] sm:$0xff]  ;;  %v165_v50 = vld [vmem:[%s7640_s0 + $0x428] sm:$0xff]  ;;  %v182_v53 = vld [vmem:[%s7640_s0 + $0x4b0] sm:$0xff] }
  0x61   :  { %v196_v51 = vld [vmem:[%s7640_s0 + $0x520] sm:$0xff]  ;;  %v197_v52 = vld [vmem:[%s7640_s0 + $0x528] sm:$0xff]  ;;  %v183_v54 = vld [vmem:[%s7640_s0 + $0x4b8] sm:$0xff] }
  0x62   :  { %v214_v55 = vld [vmem:[%s7640_s0 + $0x5b0] sm:$0xff]  ;;  %v167_v0 = vld [vmem:[%s7640_s0 + $0x438] sm:$0xff]  ;;  %v184_v3 = vld [vmem:[%s7640_s0 + $0x4c0] sm:$0xff] }
  0x63   :  { %v166_v63 = vld [vmem:[%s7640_s0 + $0x430] sm:$0xff]  ;;  %v199_v2 = vld [vmem:[%s7640_s0 + $0x538] sm:$0xff]  ;;  %v185_v5 = vld [vmem:[%s7640_s0 + $0x4c8] sm:$0xff] }
  0x64   :  { %v198_v1 = vld [vmem:[%s7640_s0 + $0x530] sm:$0xff]  ;;  %v216_v6 = vld [vmem:[%s7640_s0 + $0x5c0] sm:$0xff]  ;;  %v169_v14 = vld [vmem:[%s7640_s0 + $0x448] sm:$0xff] }
  0x65   :  { %v168_v13 = vld [vmem:[%s7640_s0 + $0x440] sm:$0xff]  ;;  %v201_v16 = vld [vmem:[%s7640_s0 + $0x548] sm:$0xff]  ;;  %v186_v17 = vld [vmem:[%s7640_s0 + $0x4d0] sm:$0xff] }
  0x66   :  { %v200_v15 = vld [vmem:[%s7640_s0 + $0x540] sm:$0xff]  ;;  %v187_v18 = vld [vmem:[%s7640_s0 + $0x4d8] sm:$0xff]  ;;  %v218_v19 = vld [vmem:[%s7640_s0 + $0x5d0] sm:$0xff] }
  0x67   :  { %5023 = vmatpush3.bf16.xpose.msk.msra.mxu0 %vm5944_vm1, %v5021_v43  ;;  %5071 = vmatpush3.bf16.xpose.msk.msra.mxu1 %vm5944_vm1, %v5069_v44  ;;  %v213_v43 = vld [vmem:[%s7640_s0 + $0x5a8] sm:$0xff]  ;;  %v5099_v44 = vpack.c.bf16 %v163_v37, %v162_v36  ;;  %v5120_v24 = vpack.c.bf16 %v187_v18, %v186_v17  ;;  %v1875_v26 = vld [vmem:[%s7644_s4 + $0x10] sm:$0xff]  ;;  %v171_v28 = vld [vmem:[%s7640_s0 + $0x458] sm:$0xff] }
  0x68   :  { %5026 = vmatprep.subr.msk.bf16.mxu0 %vm5944_vm1, %v5024_v46  ;;  %5074 = vmatprep.subr.msk.bf16.mxu1 %vm5944_vm1, %v5072_v47  ;;  %v5147_v46 = vpack.c.bf16 %v195_v39, %v194_v38  ;;  %v5102_v47 = vpack.c.bf16 %v181_v41, %v180_v40  ;;  %v5150_v48 = vpack.c.bf16 %v213_v43, %v212_v42  ;;  %v170_v27 = vld [vmem:[%s7640_s0 + $0x450] sm:$0xff]  ;;  %v203_v30 = vld [vmem:[%s7640_s0 + $0x558] sm:$0xff]  ;;  %v188_v31 = vld [vmem:[%s7640_s0 + $0x4e0] sm:$0xff] }
  0x69   :  { %v202_v29 = vld [vmem:[%s7640_s0 + $0x550] sm:$0xff]  ;;  %v4534_v36 = vld [vmem:[%s7644_s4 + $0x20] sm:$0xff]  ;;  %v1876_v37 = vld [vmem:[%s7644_s4 + $0x18] sm:$0xff]  ;;  %v5123_v38 = vpack.c.bf16 %v171_v28, %v170_v27 }
  0x6a   :  { %v5171_v39 = vpack.c.bf16 %v203_v30, %v202_v29  ;;  %v4536_v42 = vld [vmem:[%s7644_s4 + $0x30] sm:$0xff]  ;;  %v172_v43 = vld [vmem:[%s7640_s0 + $0x460] sm:$0xff]  ;;  %v275_v17 = vld [vmem:[%s7640_s0 + $0x798] sm:$0xff] }
  0x6b   :  { %v245_v27 = vld [vmem:[%s7640_s0 + $0x6a8] sm:$0xff]  ;;  %v276_v28 = vld [vmem:[%s7640_s0 + $0x7a0] sm:$0xff] }
  0x6c   :  { %v277_v29 = vld [vmem:[%s7640_s0 + $0x7a8] sm:$0xff] }
  0x6f   :  { %5029 = vmatpush3.bf16.xpose.msk.msra.mxu0 %vm5944_vm1, %v5027_v56  ;;  %5077 = vmatpush3.bf16.xpose.msk.msra.mxu1 %vm5944_vm1, %v5075_v58  ;;  %v215_v56 = vld [vmem:[%s7640_s0 + $0x5b8] sm:$0xff]  ;;  %v5105_v58 = vpack.c.bf16 %v165_v50, %v164_v49  ;;  %v4535_v49 = vld [vmem:[%s7644_s4 + $0x28] sm:$0xff] }
  0x70   :  { %5032 = vmatprep.subr.msk.bf16.mxu0 %vm5944_vm1, %v5030_v59  ;;  %5080 = vmatprep.subr.msk.bf16.mxu1 %vm5944_vm1, %v5078_v61  ;;  %v5153_v59 = vpack.c.bf16 %v197_v52, %v196_v51  ;;  %v5108_v61 = vpack.c.bf16 %v183_v54, %v182_v53  ;;  %v5156_v62 = vpack.c.bf16 %v215_v56, %v214_v55  ;;  %v191_v50 = vld [vmem:[%s7640_s0 + $0x4f8] sm:$0xff]  ;;  %v222_v51 = vld [vmem:[%s7640_s0 + $0x5f0] sm:$0xff] }
  0x71   :  { %v223_v52 = vld [vmem:[%s7640_s0 + $0x5f8] sm:$0xff] }
  0x72   :  { %v4537_v53 = vld [vmem:[%s7644_s4 + $0x38] sm:$0xff] }
  0x77   :  { %5035 = vmatpush3.bf16.xpose.msk.msra.mxu0 %vm5944_vm1, %v5033_v7  ;;  %5083 = vmatpush3.bf16.xpose.msk.msra.mxu1 %vm5944_vm1, %v5081_v9  ;;  %v217_v7 = vld [vmem:[%s7640_s0 + $0x5c8] sm:$0xff]  ;;  %v5111_v9 = vpack.c.bf16 %v167_v0, %v166_v63  ;;  %v207_v63 = vld [vmem:[%s7640_s0 + $0x578] sm:$0xff]  ;;  %v240_v0 = vld [vmem:[%s7640_s0 + $0x680] sm:$0xff] }
  0x78   :  { %5038 = vmatprep.subr.msk.bf16.mxu0 %vm5944_vm1, %v5036_v10  ;;  %5086 = vmatprep.subr.msk.bf16.mxu1 %vm5944_vm1, %v5084_v11  ;;  %v5159_v10 = vpack.c.bf16 %v199_v2, %v198_v1  ;;  %v5114_v11 = vpack.c.bf16 %v185_v5, %v184_v3  ;;  %v5162_v12 = vpack.c.bf16 %v217_v7, %v216_v6  ;;  %v241_v1 = vld [vmem:[%s7640_s0 + $0x688] sm:$0xff]  ;;  %v272_v2 = vld [vmem:[%s7640_s0 + $0x780] sm:$0xff] }
  0x79   :  { %v273_v3 = vld [vmem:[%s7640_s0 + $0x788] sm:$0xff]  ;;  %v5186_v7 = vpack.c.bf16 %v241_v1, %v240_v0  ;;  %v250_v0 = vld [vmem:[%s7640_s0 + $0x6d0] sm:$0xff]  ;;  %v251_v1 = vld [vmem:[%s7640_s0 + $0x6d8] sm:$0xff] }
  0x7f   :  { %5041 = vmatpush3.bf16.xpose.msk.msra.mxu0 %vm5944_vm1, %v5039_v20  ;;  %5089 = vmatpush3.bf16.xpose.msk.msra.mxu1 %vm5944_vm1, %v5087_v21  ;;  %v219_v20 = vld [vmem:[%s7640_s0 + $0x5d8] sm:$0xff]  ;;  %v5117_v21 = vpack.c.bf16 %v169_v14, %v168_v13  ;;  %v257_v13 = vld [vmem:[%s7640_s0 + $0x708] sm:$0xff]  ;;  %v242_v14 = vld [vmem:[%s7640_s0 + $0x690] sm:$0xff] }
  0x80   :  { %5092 = vmatprep.subr.msk.bf16.mxu0 %vm5944_vm1, %v5090_v22  ;;  %5140 = vmatprep.subr.msk.bf16.mxu1 %vm5944_vm1, %v5138_v23  ;;  %v5165_v22 = vpack.c.bf16 %v201_v16, %v200_v15  ;;  %v1873_v23 = vld [vmem:[%s7644_s4] sm:$0xff]  ;;  %v5168_v25 = vpack.c.bf16 %v219_v20, %v218_v19  ;;  %v243_v15 = vld [vmem:[%s7640_s0 + $0x698] sm:$0xff]  ;;  %v274_v16 = vld [vmem:[%s7640_s0 + $0x790] sm:$0xff] }
  0x81   :  { %1879 = vperm.xlu0 %5478, %v1873_v23   ;;  %v5192_v20 = vpack.c.bf16 %v243_v15, %v242_v14  ;;  %v227_v23 = vld [vmem:[%s7640_s0 + $0x618] sm:$0xff]  ;;  %v252_v14 = vld [vmem:[%s7640_s0 + $0x6e0] sm:$0xff]  ;;  %v253_v15 = vld [vmem:[%s7640_s0 + $0x6e8] sm:$0xff] }
  0x85   :  { %1889 = vperm.xlu0 %5478, %v1875_v26   ;;  %v244_v26 = vld [vmem:[%s7640_s0 + $0x6a0] sm:$0xff] }
  0x86   :  { %4691 = vmatmul.mubr.msk.f32.vlgmr.msra.gmra.mrb[8].mxu0 %vm312_vm0, %v6056_v45  ;;  %4731 = vmatmul.mubr.msk.f32.vlgmr.msra.gmra.mrb[8].mxu1 %vm312_vm0, %v6056_v45 }
  0x87   :  { %5095 = vmatpush3.bf16.xpose.msk.msra.mxu0 %vm5944_vm1, %v5093_v32  ;;  %5143 = vmatpush3.bf16.xpose.msk.msra.mxu1 %vm5944_vm1, %v5141_v33  ;;  %v1874_v32 = vld [vmem:[%s7644_s4 + $0x8] sm:$0xff] }
  0x88   :  { %4692 = vmatprep.mubr.msk.f32.mxu0 %vm312_vm0, %v6259_v57  ;;  %4732 = vmatprep.mubr.msk.f32.mxu1 %vm312_vm0, %v6259_v57  ;;  %v189_v33 = vld [vmem:[%s7640_s0 + $0x4e8] sm:$0xff] }
  0x89   :  { %5098 = vmatprep.subr.msk.bf16.mxu0 %vm5944_vm1, %v5096_v34  ;;  %5146 = vmatprep.subr.msk.bf16.mxu1 %vm5944_vm1, %v5144_v35  ;;  %v220_v34 = vld [vmem:[%s7640_s0 + $0x5e0] sm:$0xff]  ;;  %v221_v35 = vld [vmem:[%s7640_s0 + $0x5e8] sm:$0xff]  ;;  %v5126_v40 = vpack.c.bf16 %v189_v33, %v188_v31  ;;  %v5246_v33 = vpack.c.bf16 %v277_v29, %v276_v28  ;;  %v286_v28 = vld [vmem:[%s7640_s0 + $0x7f0] sm:$0xff] }
  0x8a   :  { %4693 = vmatmul.mubr.msk.f32.gmra.mrb[10].mxu0 %vm312_vm0, %v6259_v57  ;;  %4733 = vmatmul.mubr.msk.f32.gmra.mrb[10].mxu1 %vm312_vm0, %v6259_v57  ;;  %v5174_v41 = vpack.c.bf16 %v221_v35, %v220_v34  ;;  %v228_v34 = vld [vmem:[%s7640_s0 + $0x620] sm:$0xff]  ;;  %v229_v35 = vld [vmem:[%s7640_s0 + $0x628] sm:$0xff]  ;;  %v287_v29 = vld [vmem:[%s7640_s0 + $0x7f8] sm:$0xff] }
  0x8b   :  { %4694 = vmatprep.mubr.msk.f32.mxu0 %vm312_vm0, %v6272_v60  ;;  %4734 = vmatprep.mubr.msk.f32.mxu1 %vm312_vm0, %v6272_v60 }
  0x8c   :  { %1884 = vperm.xlu1 %5479, %v1874_v32   ;;  %2698 = vperm.xlu0 %5478, %v4534_v36   ;;  %v5198_v32 = vpack.c.bf16 %v245_v27, %v244_v26  ;;  %v260_v36 = vld [vmem:[%s7640_s0 + $0x720] sm:$0xff]  ;;  %v254_v26 = vld [vmem:[%s7640_s0 + $0x6f0] sm:$0xff]  ;;  %v255_v27 = vld [vmem:[%s7640_s0 + $0x6f8] sm:$0xff] }
  0x8e   :  { %4695 = vmatmul.mubr.msk.f32.gmra.mrb[12].mxu0 %vm312_vm0, %v6272_v60  ;;  %4735 = vmatmul.mubr.msk.f32.gmra.mrb[12].mxu1 %vm312_vm0, %v6272_v60 }
  0x8f   :  { %5101 = vmatpush3.bf16.xpose.msk.msra.mxu0 %vm5944_vm1, %v5099_v44  ;;  %5149 = vmatpush3.bf16.xpose.msk.msra.mxu1 %vm5944_vm1, %v5147_v46  ;;  %v173_v44 = vld [vmem:[%s7640_s0 + $0x468] sm:$0xff]  ;;  %v204_v46 = vld [vmem:[%s7640_s0 + $0x560] sm:$0xff] }
  0x90   :  { %4696 = vmatprep.mubr.msk.f32.mxu0 %vm312_vm0, %v6317_v8  ;;  %4736 = vmatprep.mubr.msk.f32.mxu1 %vm312_vm0, %v6317_v8  ;;  %v5129_v54 = vpack.c.bf16 %v173_v44, %v172_v43 }
  0x91   :  { %5104 = vmatprep.subr.msk.bf16.mxu0 %vm5944_vm1, %v5102_v47  ;;  %5152 = vmatprep.subr.msk.bf16.mxu1 %vm5944_vm1, %v5150_v48  ;;  %v205_v47 = vld [vmem:[%s7640_s0 + $0x568] sm:$0xff]  ;;  %v190_v48 = vld [vmem:[%s7640_s0 + $0x4f0] sm:$0xff] }
  0x92   :  { %4697 = vmatmul.mubr.msk.f32.gmra.mrb[14].mxu0 %vm312_vm0, %v6317_v8  ;;  %4737 = vmatmul.mubr.msk.f32.gmra.mrb[14].mxu1 %vm312_vm0, %v6317_v8  ;;  %v5177_v55 = vpack.c.bf16 %v205_v47, %v204_v46  ;;  %v5132_v56 = vpack.c.bf16 %v191_v50, %v190_v48  ;;  %v230_v47 = vld [vmem:[%s7640_s0 + $0x630] sm:$0xff]  ;;  %v231_v48 = vld [vmem:[%s7640_s0 + $0x638] sm:$0xff]  ;;  %v248_v50 = vld [vmem:[%s7640_s0 + $0x6c0] sm:$0xff] }
  0x93   :  { %4770 = vmatprep.mubr.msk.f32.mxu0 %vm312_vm0, %v6056_v45  ;;  %4810 = vmatprep.mubr.msk.f32.mxu1 %vm312_vm0, %v6056_v45 }
  0x94   :  { %1894 = vperm.xlu1 %5479, %v1876_v37   ;;  %2708 = vperm.xlu0 %5478, %v4536_v42   ;;  %v261_v37 = vld [vmem:[%s7640_s0 + $0x728] sm:$0xff]  ;;  %v5201_v42 = vpack.c.bf16 %v229_v35, %v228_v34  ;;  %v238_v34 = vld [vmem:[%s7640_s0 + $0x670] sm:$0xff]  ;;  %v239_v35 = vld [vmem:[%s7640_s0 + $0x678] sm:$0xff] }
  0x95   :  { %v5249_v43 = vpack.c.bf16 %v261_v37, %v260_v36  ;;  %v270_v36 = vld [vmem:[%s7640_s0 + $0x770] sm:$0xff]  ;;  %v271_v37 = vld [vmem:[%s7640_s0 + $0x778] sm:$0xff] }
  0x97   :  { %5107 = vmatpush3.bf16.xpose.msk.msra.mxu0 %vm5944_vm1, %v5105_v58  ;;  %5155 = vmatpush3.bf16.xpose.msk.msra.mxu1 %vm5944_vm1, %v5153_v59  ;;  %v5180_v58 = vpack.c.bf16 %v223_v52, %v222_v51  ;;  %v174_v59 = vld [vmem:[%s7640_s0 + $0x470] sm:$0xff]  ;;  %v249_v51 = vld [vmem:[%s7640_s0 + $0x6c8] sm:$0xff]  ;;  %v280_v52 = vld [vmem:[%s7640_s0 + $0x7c0] sm:$0xff] }
  0x98   :  { %5110 = vmatprep.subr.msk.bf16.mxu0 %vm5944_vm1, %v5108_v61  ;;  %5158 = vmatprep.subr.msk.bf16.mxu1 %vm5944_vm1, %v5156_v62  ;;  %v175_v61 = vld [vmem:[%s7640_s0 + $0x478] sm:$0xff]  ;;  %v206_v62 = vld [vmem:[%s7640_s0 + $0x570] sm:$0xff] }
  0x99   :  { %2703 = vperm.xlu1 %5479, %v4535_v49   ;;  %v5135_v5 = vpack.c.bf16 %v175_v61, %v174_v59  ;;  %v5183_v6 = vpack.c.bf16 %v207_v63, %v206_v62  ;;  %v263_v49 = vld [vmem:[%s7640_s0 + $0x738] sm:$0xff]  ;;  %v232_v59 = vld [vmem:[%s7640_s0 + $0x640] sm:$0xff]  ;;  %v233_v61 = vld [vmem:[%s7640_s0 + $0x648] sm:$0xff] }
  0x9a   :  { %v264_v62 = vld [vmem:[%s7640_s0 + $0x740] sm:$0xff]  ;;  %v265_v63 = vld [vmem:[%s7640_s0 + $0x748] sm:$0xff] }
  0x9d   :  { %2713 = vperm.xlu1 %5479, %v4537_v53   ;;  %v281_v53 = vld [vmem:[%s7640_s0 + $0x7c8] sm:$0xff] }
  0x9f   :  { %5113 = vmatpush3.bf16.xpose.msk.msra.mxu0 %vm5944_vm1, %v5111_v9  ;;  %5161 = vmatpush3.bf16.xpose.msk.msra.mxu1 %vm5944_vm1, %v5159_v10  ;;  %v5234_v9 = vpack.c.bf16 %v273_v3, %v272_v2  ;;  %v224_v10 = vld [vmem:[%s7640_s0 + $0x600] sm:$0xff]  ;;  %v282_v2 = vld [vmem:[%s7640_s0 + $0x7d0] sm:$0xff]  ;;  %v283_v3 = vld [vmem:[%s7640_s0 + $0x7d8] sm:$0xff] }
  0xa0   :  { %5116 = vmatprep.subr.msk.bf16.mxu0 %vm5944_vm1, %v5114_v11  ;;  %5164 = vmatprep.subr.msk.bf16.mxu1 %vm5944_vm1, %v5162_v12  ;;  %v225_v11 = vld [vmem:[%s7640_s0 + $0x608] sm:$0xff]  ;;  %v256_v12 = vld [vmem:[%s7640_s0 + $0x700] sm:$0xff] }
  0xa1   :  { %v5189_v18 = vpack.c.bf16 %v225_v11, %v224_v10  ;;  %v5237_v19 = vpack.c.bf16 %v257_v13, %v256_v12  ;;  %v234_v10 = vld [vmem:[%s7640_s0 + $0x650] sm:$0xff]  ;;  %v235_v11 = vld [vmem:[%s7640_s0 + $0x658] sm:$0xff] }
  0xa2   :  { %v266_v12 = vld [vmem:[%s7640_s0 + $0x750] sm:$0xff]  ;;  %v267_v13 = vld [vmem:[%s7640_s0 + $0x758] sm:$0xff] }
  0xa7   :  { %5119 = vmatpush3.bf16.xpose.msk.msra.mxu0 %vm5944_vm1, %v5117_v21  ;;  %5167 = vmatpush3.bf16.xpose.msk.msra.mxu1 %vm5944_vm1, %v5165_v22  ;;  %v5240_v21 = vpack.c.bf16 %v275_v17, %v274_v16  ;;  %v226_v22 = vld [vmem:[%s7640_s0 + $0x610] sm:$0xff]  ;;  %v284_v16 = vld [vmem:[%s7640_s0 + $0x7e0] sm:$0xff]  ;;  %v285_v17 = vld [vmem:[%s7640_s0 + $0x7e8] sm:$0xff] }
  0xa8   :  { %5122 = vmatprep.subr.msk.bf16.mxu0 %vm5944_vm1, %v5120_v24  ;;  %5170 = vmatprep.subr.msk.bf16.mxu1 %vm5944_vm1, %v5168_v25  ;;  %v258_v24 = vld [vmem:[%s7640_s0 + $0x710] sm:$0xff]  ;;  %v259_v25 = vld [vmem:[%s7640_s0 + $0x718] sm:$0xff]  ;;  %v5195_v30 = vpack.c.bf16 %v227_v23, %v226_v22  ;;  %v236_v22 = vld [vmem:[%s7640_s0 + $0x660] sm:$0xff] }
  0xa9   :  { %v5243_v31 = vpack.c.bf16 %v259_v25, %v258_v24  ;;  %v237_v23 = vld [vmem:[%s7640_s0 + $0x668] sm:$0xff]  ;;  %v268_v24 = vld [vmem:[%s7640_s0 + $0x760] sm:$0xff] }
  0xaa   :  { %v269_v25 = vld [vmem:[%s7640_s0 + $0x768] sm:$0xff] }
  0xaf   :  { %5125 = vmatpush3.bf16.xpose.msk.msra.mxu0 %vm5944_vm1, %v5123_v38  ;;  %5173 = vmatpush3.bf16.xpose.msk.msra.mxu1 %vm5944_vm1, %v5171_v39  ;;  %v246_v38 = vld [vmem:[%s7640_s0 + $0x6b0] sm:$0xff]  ;;  %v247_v39 = vld [vmem:[%s7640_s0 + $0x6b8] sm:$0xff] }
  0xb0   :  { %5128 = vmatprep.subr.msk.bf16.mxu0 %vm5944_vm1, %v5126_v40  ;;  %5176 = vmatprep.subr.msk.bf16.mxu1 %vm5944_vm1, %v5174_v41  ;;  %v278_v40 = vld [vmem:[%s7640_s0 + $0x7b0] sm:$0xff]  ;;  %v279_v41 = vld [vmem:[%s7640_s0 + $0x7b8] sm:$0xff]  ;;  %v5204_v44 = vpack.c.bf16 %v247_v39, %v246_v38  ;;  %v5231_v38 = vpack.c.bf16 %v239_v35, %v238_v34  ;;  %v5279_v39 = vpack.c.bf16 %v271_v37, %v270_v36 }
  0xb1   :  { %v5252_v46 = vpack.c.bf16 %v279_v41, %v278_v40  ;;  %v5864_v40 = vld [vmem:[%s7641_s1] sm:$0xff] }
  0xb7   :  { %5131 = vmatpush3.bf16.xpose.msk.msra.mxu0 %vm5944_vm1, %v5129_v54  ;;  %5179 = vmatpush3.bf16.xpose.msk.msra.mxu1 %vm5944_vm1, %v5177_v55  ;;  %v5207_v54 = vpack.c.bf16 %v231_v48, %v230_v47 }
  0xb8   :  { %5134 = vmatprep.subr.msk.bf16.mxu0 %vm5944_vm1, %v5132_v56  ;;  %5182 = vmatprep.subr.msk.bf16.mxu1 %vm5944_vm1, %v5180_v58  ;;  %v5210_v56 = vpack.c.bf16 %v249_v51, %v248_v50  ;;  %v5258_v58 = vpack.c.bf16 %v281_v53, %v280_v52 }
  0xbf   :  { %5137 = vmatpush3.bf16.xpose.msk.msra.mxu0 %vm5944_vm1, %v5135_v5  ;;  %5185 = vmatpush3.bf16.xpose.msk.msra.mxu1 %vm5944_vm1, %v5183_v6  ;;  %v5213_v5 = vpack.c.bf16 %v233_v61, %v232_v59  ;;  %v5261_v6 = vpack.c.bf16 %v265_v63, %v264_v62 }
  0xc0   :  { %5188 = vmatprep.subr.msk.bf16.mxu0 %vm5944_vm1, %v5186_v7  ;;  %5236 = vmatprep.subr.msk.bf16.mxu1 %vm5944_vm1, %v5234_v9  ;;  %v5216_v7 = vpack.c.bf16 %v251_v1, %v250_v0  ;;  %v5264_v9 = vpack.c.bf16 %v283_v3, %v282_v2 }
  0xc6   :  { %4771 = vmatmul.mubr.msk.f32.vlgmr.msra.gmra.mrb[16].mxu0 %vm312_vm0, %v6056_v45  ;;  %4811 = vmatmul.mubr.msk.f32.vlgmr.msra.gmra.mrb[16].mxu1 %vm312_vm0, %v6056_v45 }
  0xc7   :  { %5191 = vmatpush3.bf16.xpose.msk.msra.mxu0 %vm5944_vm1, %v5189_v18  ;;  %5239 = vmatpush3.bf16.xpose.msk.msra.mxu1 %vm5944_vm1, %v5237_v19  ;;  %v5219_v18 = vpack.c.bf16 %v235_v11, %v234_v10  ;;  %v5267_v19 = vpack.c.bf16 %v267_v13, %v266_v12 }
  0xc8   :  { %4772 = vmatprep.mubr.msk.f32.mxu0 %vm312_vm0, %v6259_v57  ;;  %4812 = vmatprep.mubr.msk.f32.mxu1 %vm312_vm0, %v6259_v57 }
  0xc9   :  { %5194 = vmatprep.subr.msk.bf16.mxu0 %vm5944_vm1, %v5192_v20  ;;  %5242 = vmatprep.subr.msk.bf16.mxu1 %vm5944_vm1, %v5240_v21  ;;  %v5222_v20 = vpack.c.bf16 %v253_v15, %v252_v14  ;;  %v5270_v21 = vpack.c.bf16 %v285_v17, %v284_v16 }
  0xca   :  { %4773 = vmatmul.mubr.msk.f32.gmra.mrb[18].mxu0 %vm312_vm0, %v6259_v57  ;;  %4813 = vmatmul.mubr.msk.f32.gmra.mrb[18].mxu1 %vm312_vm0, %v6259_v57 }
  0xcb   :  { %4774 = vmatprep.mubr.msk.f32.mxu0 %vm312_vm0, %v6272_v60  ;;  %4814 = vmatprep.mubr.msk.f32.mxu1 %vm312_vm0, %v6272_v60 }
  0xce   :  { %4775 = vmatmul.mubr.msk.f32.gmra.mrb[20].mxu0 %vm312_vm0, %v6272_v60  ;;  %4815 = vmatmul.mubr.msk.f32.gmra.mrb[20].mxu1 %vm312_vm0, %v6272_v60 }
  0xcf   :  { %5197 = vmatpush3.bf16.xpose.msk.msra.mxu0 %vm5944_vm1, %v5195_v30  ;;  %5245 = vmatpush3.bf16.xpose.msk.msra.mxu1 %vm5944_vm1, %v5243_v31  ;;  %v5225_v30 = vpack.c.bf16 %v237_v23, %v236_v22  ;;  %v5273_v31 = vpack.c.bf16 %v269_v25, %v268_v24 }
  0xd0   :  { %4776 = vmatprep.mubr.msk.f32.mxu0 %vm312_vm0, %v6317_v8  ;;  %4816 = vmatprep.mubr.msk.f32.mxu1 %vm312_vm0, %v6317_v8 }
  0xd1   :  { %5200 = vmatprep.subr.msk.bf16.mxu0 %vm5944_vm1, %v5198_v32  ;;  %5248 = vmatprep.subr.msk.bf16.mxu1 %vm5944_vm1, %v5246_v33  ;;  %v5228_v32 = vpack.c.bf16 %v255_v27, %v254_v26  ;;  %v5276_v33 = vpack.c.bf16 %v287_v29, %v286_v28 }
  0xd2   :  { %4777 = vmatmul.mubr.msk.f32.gmra.mrb[22].mxu0 %vm312_vm0, %v6317_v8  ;;  %4817 = vmatmul.mubr.msk.f32.gmra.mrb[22].mxu1 %vm312_vm0, %v6317_v8 }
  0xd3   :  { %4850 = vmatprep.mubr.msk.f32.mxu0 %vm312_vm0, %v6056_v45  ;;  %4890 = vmatprep.mubr.msk.f32.mxu1 %vm312_vm0, %v6056_v45  ;;  %v262_v45 = vld [vmem:[%s7640_s0 + $0x730] sm:$0xff] }
  0xd4   :  { %v5255_v55 = vpack.c.bf16 %v263_v49, %v262_v45  ;;  %v7158_v45 = vpop.permute.xlu1 %304 }
  0xd7   :  { %5203 = vmatpush3.bf16.xpose.msk.msra.mxu0 %vm5944_vm1, %v5201_v42  ;;  %5251 = vmatpush3.bf16.xpose.msk.msra.mxu1 %vm5944_vm1, %v5249_v43 }
  0xd8   :  { %5206 = vmatprep.subr.msk.bf16.mxu0 %vm5944_vm1, %v5204_v44  ;;  %5254 = vmatprep.subr.msk.bf16.mxu1 %vm5944_vm1, %v5252_v46  ;;  %v7168_v3 = vpop.permute.xlu1 %309 }
  0xdf   :  { %5209 = vmatpush3.bf16.xpose.msk.msra.mxu0 %vm5944_vm1, %v5207_v54  ;;  %5257 = vmatpush3.bf16.xpose.msk.msra.mxu1 %vm5944_vm1, %v5255_v55 }
  0xe0   :  { %5212 = vmatprep.subr.msk.bf16.mxu0 %vm5944_vm1, %v5210_v56  ;;  %5260 = vmatprep.subr.msk.bf16.mxu1 %vm5944_vm1, %v5258_v58 }
  0xe7   :  { %5215 = vmatpush3.bf16.xpose.msk.msra.mxu0 %vm5944_vm1, %v5213_v5  ;;  %5263 = vmatpush3.bf16.xpose.msk.msra.mxu1 %vm5944_vm1, %v5261_v6 }
  0xe8   :  { %5218 = vmatprep.subr.msk.bf16.mxu0 %vm5944_vm1, %v5216_v7  ;;  %5266 = vmatprep.subr.msk.bf16.mxu1 %vm5944_vm1, %v5264_v9 }
  0xef   :  { %5221 = vmatpush3.bf16.xpose.msk.msra.mxu0 %vm5944_vm1, %v5219_v18  ;;  %5269 = vmatpush3.bf16.xpose.msk.msra.mxu1 %vm5944_vm1, %v5267_v19 }
  0xf0   :  { %5224 = vmatprep.subr.msk.bf16.mxu0 %vm5944_vm1, %v5222_v20  ;;  %5272 = vmatprep.subr.msk.bf16.mxu1 %vm5944_vm1, %v5270_v21 }
  0xf7   :  { %5227 = vmatpush3.bf16.xpose.msk.msra.mxu0 %vm5944_vm1, %v5225_v30  ;;  %5275 = vmatpush3.bf16.xpose.msk.msra.mxu1 %vm5944_vm1, %v5273_v31 }
  0xf8   :  { %5230 = vmatprep.subr.msk.bf16.mxu0 %vm5944_vm1, %v5228_v32  ;;  %5278 = vmatprep.subr.msk.bf16.mxu1 %vm5944_vm1, %v5276_v33 }
  0xff   :  { %5233 = vmatpush3.bf16.xpose.msk.msra.mxu0 %vm5944_vm1, %v5231_v38  ;;  %5281 = vmatpush3.bf16.xpose.msk.msra.mxu1 %vm5944_vm1, %v5279_v39  ;;  %v7177_v38 = vld [vmem:[%s7643_s3] sm:$0xff]  ;;  %v7187_v39 = vld [vmem:[%s7643_s3 + $0x8] sm:$0xff] }
 0x106   :  { %4851 = vmatmul.mubr.msk.f32.vlgmr.msra.gmra.mrb[24].mxu0 %vm312_vm0, %v5864_v40  ;;  %4891 = vmatmul.mubr.msk.f32.vlgmr.msra.gmra.mrb[24].mxu1 %vm312_vm0, %v5864_v40  ;;  %v7198_v40 = vld [vmem:[%s7643_s3 + $0x10] sm:$0xff] }
 0x107   :  { %4852 = vmatprep.mubr.msk.f32.mxu0 %vm312_vm0, %v6259_v57  ;;  %4892 = vmatprep.mubr.msk.f32.mxu1 %vm312_vm0, %v6259_v57 }
 0x10a   :  { %4853 = vmatmul.mubr.msk.f32.gmra.mrb[26].mxu0 %vm312_vm0, %v6259_v57  ;;  %4893 = vmatmul.mubr.msk.f32.gmra.mrb[26].mxu1 %vm312_vm0, %v6259_v57  ;;  %v7150_v57 = vpop.permute.xlu0 %294 }
 0x10b   :  { %4854 = vmatprep.mubr.msk.f32.mxu0 %vm312_vm0, %v6272_v60  ;;  %4894 = vmatprep.mubr.msk.f32.mxu1 %vm312_vm0, %v6272_v60 }
 0x10e   :  { %4855 = vmatmul.mubr.msk.f32.gmra.mrb[28].mxu0 %vm312_vm0, %v6272_v60  ;;  %4895 = vmatmul.mubr.msk.f32.gmra.mrb[28].mxu1 %vm312_vm0, %v6272_v60 }
 0x10f   :  { %4856 = vmatprep.mubr.msk.f32.mxu0 %vm312_vm0, %v6317_v8  ;;  %4896 = vmatprep.mubr.msk.f32.mxu1 %vm312_vm0, %v6317_v8 }
 0x112   :  { %4857 = vmatmul.mubr.msk.f32.gmra.mrb[30].mxu0 %vm312_vm0, %v6317_v8  ;;  %4897 = vmatmul.mubr.msk.f32.gmra.mrb[30].mxu1 %vm312_vm0, %v6317_v8  ;;  %v7156_v8 = vpop.permute.xlu0 %299 }
 0x113   :  { %1974 = vmatprep.mubr.f32.mxu0 %v5890_v4  ;;  %2063 = vmatprep.mubr.f32.mxu1 %v5890_v4 }
 0x118   :  { %v1159_v60 = vpop.f32.mrb[0].mxu0 }
 0x119   :  { %v1248_v41 = vpop.f32.mrb[0].mxu1  ;;  %v1160_v42 = vadd.f32 %v1159_v60, %v7150_v57  ;;  %v1161_v44 = vpop.f32.mrb[1].mxu0  ;;  %v7209_v60 = vld [vmem:[%s7643_s3 + $0x18] sm:$0xff] }
 0x11a   :  { %v1249_v43 = vadd.f32 %v1248_v41, %v7150_v57  ;;  %v1250_v46 = vpop.f32.mrb[1].mxu1  ;;  %v1162_v47 = vadd.f32 %v1161_v44, %v7150_v57 }
 0x11b   :  { %v1251_v48 = vadd.f32 %v1250_v46, %v7150_v57  ;;  %5480 = vtanh.f32 %v1160_v42 }
 0x11c   :  { %5482 = vtanh.f32 %v1249_v43 }
 0x11d   :  { %v1165_v49 = vpop.f32.mrb[2].mxu0  ;;  %v1254_v50 = vpop.f32.mrb[2].mxu1  ;;  %5484 = vtanh.f32 %v1162_v47 }
 0x11e   :  { %v1166_v51 = vadd.f32 %v1165_v49, %v7156_v8  ;;  %v1255_v52 = vadd.f32 %v1254_v50, %v7156_v8  ;;  %v1167_v53 = vpop.f32.mrb[3].mxu0  ;;  %v1256_v54 = vpop.f32.mrb[3].mxu1  ;;  %5486 = vtanh.f32 %v1251_v48 }
 0x11f   :  { %v1168_v55 = vadd.f32 %v1167_v53, %v7156_v8  ;;  %v1257_v56 = vadd.f32 %v1256_v54, %v7156_v8 }
 0x120   :  { %5488 = vtanh.f32 %v1166_v51 }
 0x121   :  { %5490 = vtanh.f32 %v1255_v52  ;;  %v1171_v58 = vpop.f32.mrb[4].mxu0  ;;  %v1260_v59 = vpop.f32.mrb[4].mxu1 }
 0x122   :  { %5492 = vtanh.f32 %v1168_v55  ;;  %v1172_v61 = vadd.f32 %v1171_v58, %v7158_v45  ;;  %v1261_v62 = vadd.f32 %v1260_v59, %v7158_v45  ;;  %v1173_v63 = vpop.f32.mrb[5].mxu0  ;;  %v1262_v0 = vpop.f32.mrb[5].mxu1 }
 0x123   :  { %5494 = vtanh.f32 %v1257_v56  ;;  %v1174_v1 = vadd.f32 %v1173_v63, %v7158_v45  ;;  %v1263_v2 = vadd.f32 %v1262_v0, %v7158_v45 }
 0x124   :  { %5496 = vtanh.f32 %v1172_v61 }
 0x125   :  { %5498 = vtanh.f32 %v1261_v62  ;;  %v1177_v5 = vpop.f32.mrb[6].mxu0  ;;  %v1266_v6 = vpop.f32.mrb[6].mxu1 }
 0x126   :  { %v5481_v7 = vpop.eup %5480  ;;  %5500 = vtanh.f32 %v1174_v1  ;;  %v1179_v9 = vpop.f32.mrb[7].mxu0  ;;  %v1178_v11 = vadd.f32 %v1177_v5, %v7168_v3  ;;  %v1267_v15 = vadd.f32 %v1266_v6, %v7168_v3 }
 0x127   :  { %v1268_v10 = vpop.f32.mrb[7].mxu1  ;;  %v5483_v12 = vpop.eup %5482  ;;  %5502 = vtanh.f32 %v1263_v2  ;;  %v1180_v13 = vadd.f32 %v1179_v9, %v7168_v3 }
 0x128   :  { %v1269_v14 = vadd.f32 %v1268_v10, %v7168_v3  ;;  %v5485_v16 = vpop.eup %5484  ;;  %5504 = vtanh.f32 %v1178_v11 }
 0x129   :  { %v5487_v17 = vpop.eup %5486  ;;  %5506 = vtanh.f32 %v1180_v13 }
 0x12a   :  { %v5489_v18 = vpop.eup %5488  ;;  %5508 = vtanh.f32 %v1269_v14 }
 0x12b   :  { %v5491_v19 = vpop.eup %5490  ;;  %v5284_v20 = vpack.c.bf16 %v5489_v18, %v5481_v7  ;;  %5510 = vtanh.f32 %v1267_v15 }
 0x12c   :  { %v5493_v21 = vpop.eup %5492  ;;  %v5292_v22 = vpack.c.bf16 %v5491_v19, %v5483_v12 }
 0x12d   :  { %v5495_v23 = vpop.eup %5494  ;;  %v5282_v24 = vpack.c.bf16 %v5493_v21, %v5485_v16 }
 0x12e   :  { %v5497_v25 = vpop.eup %5496  ;;  %v5290_v26 = vpack.c.bf16 %v5495_v23, %v5487_v17 }
 0x12f   :  { %v5499_v27 = vpop.eup %5498  ;;  %5283 = vmatprep.subr.bf16.mxu0 %v5282_v24 }
 0x130   :  { %v5501_v28 = vpop.eup %5500  ;;  %5291 = vmatprep.subr.bf16.mxu1 %v5290_v26  ;;  %5285 = vmatpush1.bf16.msra.mxu0 %v5284_v20 }
 0x131   :  { %v5503_v29 = vpop.eup %5502  ;;  %5293 = vmatpush1.bf16.msra.mxu1 %v5292_v22 }
 0x132   :  { %v5505_v30 = vpop.eup %5504 }
 0x133   :  { %v5507_v31 = vpop.eup %5506  ;;  %v5288_v32 = vpack.c.bf16 %v5505_v30, %v5497_v25 }
 0x134   :  { %v5509_v33 = vpop.eup %5508  ;;  %v5286_v34 = vpack.c.bf16 %v5507_v31, %v5501_v28 }
 0x135   :  { %v5511_v35 = vpop.eup %5510  ;;  %v5294_v36 = vpack.c.bf16 %v5509_v33, %v5503_v29 }
 0x136   :  { %5287 = vmatprep.subr.bf16.mxu0 %v5286_v34  ;;  %v5296_v37 = vpack.c.bf16 %v5511_v35, %v5499_v27 }
 0x137   :  { %5295 = vmatprep.subr.bf16.mxu1 %v5294_v36  ;;  %5289 = vmatpush1.bf16.msra.mxu0 %v5288_v32 }
 0x138   :  { %5297 = vmatpush1.bf16.msra.mxu1 %v5296_v37 }
 0x13a   :  { %4498 = vmatmul.mubr.msk.f32.vlgmr.msra.gmra.mrb[32].mxu0 %vm1897_vm2, %v7177_v38 }
 0x13b   :  { %4502 = vmatmul.mubr.msk.f32.vlgmr.msra.gmra.mrb[32].mxu1 %vm1897_vm2, %v7177_v38  ;;  %1980 = vmatprep.mubr.f32.mxu0 %v5890_v4 }
 0x13c   :  { %2069 = vmatprep.mubr.f32.mxu1 %v5890_v4 }
 0x13e   :  { %4499 = vmatmul.mubr.msk.f32.gmra.mrb[34].mxu0 %vm1897_vm2, %v7187_v39 }
 0x13f   :  { %4503 = vmatmul.mubr.msk.f32.gmra.mrb[34].mxu1 %vm1897_vm2, %v7187_v39  ;;  %1986 = vmatprep.mubr.f32.mxu0 %v5890_v4 }
 0x140   :  { %2075 = vmatprep.mubr.f32.mxu1 %v5890_v4 }
 0x142   :  { %4500 = vmatmul.mubr.msk.f32.gmra.mrb[36].mxu0 %vm1897_vm2, %v7198_v40 }
 0x143   :  { %4504 = vmatmul.mubr.msk.f32.gmra.mrb[36].mxu1 %vm1897_vm2, %v7198_v40  ;;  %1992 = vmatprep.mubr.f32.mxu0 %v5890_v4 }
 0x144   :  { %2081 = vmatprep.mubr.f32.mxu1 %v5890_v4 }
 0x146   :  { %4501 = vmatmul.mubr.msk.f32.gmra.mrb[38].mxu0 %vm1897_vm2, %v7209_v60 }
 0x147   :  { %4505 = vmatmul.mubr.msk.f32.gmra.mrb[38].mxu1 %vm1897_vm2, %v7209_v60  ;;  %2152 = vmatprep.mubr.f32.mxu0 %v5890_v4 }
 0x148   :  { %2241 = vmatprep.mubr.f32.mxu1 %v5890_v4 }
 0x159   :  { %v1337_v41 = vpop.f32.mrb[8].mxu0  ;;  %v1426_v42 = vpop.f32.mrb[8].mxu1 }
 0x15a   :  { %v1338_v43 = vadd.f32 %v1337_v41, %v7150_v57  ;;  %v1427_v44 = vadd.f32 %v1426_v42, %v7150_v57  ;;  %v1339_v46 = vpop.f32.mrb[9].mxu0  ;;  %v1428_v47 = vpop.f32.mrb[9].mxu1 }
 0x15b   :  { %v1340_v48 = vadd.f32 %v1339_v46, %v7150_v57  ;;  %v1429_v49 = vadd.f32 %v1428_v47, %v7150_v57 }
 0x15c   :  { %5512 = vtanh.f32 %v1338_v43 }
 0x15d   :  { %5514 = vtanh.f32 %v1427_v44  ;;  %v1343_v50 = vpop.f32.mrb[10].mxu0  ;;  %v1432_v51 = vpop.f32.mrb[10].mxu1 }
 0x15e   :  { %5516 = vtanh.f32 %v1340_v48  ;;  %v1344_v52 = vadd.f32 %v1343_v50, %v7156_v8  ;;  %v1433_v53 = vadd.f32 %v1432_v51, %v7156_v8  ;;  %v1345_v54 = vpop.f32.mrb[11].mxu0  ;;  %v1434_v55 = vpop.f32.mrb[11].mxu1 }
 0x15f   :  { %5518 = vtanh.f32 %v1429_v49  ;;  %v1346_v56 = vadd.f32 %v1345_v54, %v7156_v8  ;;  %v1435_v58 = vadd.f32 %v1434_v55, %v7156_v8 }
 0x160   :  { %5520 = vtanh.f32 %v1344_v52 }
 0x161   :  { %5522 = vtanh.f32 %v1433_v53  ;;  %v1349_v59 = vpop.f32.mrb[12].mxu0  ;;  %v1438_v61 = vpop.f32.mrb[12].mxu1 }
 0x162   :  { %5524 = vtanh.f32 %v1346_v56  ;;  %v1350_v62 = vadd.f32 %v1349_v59, %v7158_v45  ;;  %v1439_v63 = vadd.f32 %v1438_v61, %v7158_v45  ;;  %v1351_v0 = vpop.f32.mrb[13].mxu0  ;;  %v1440_v1 = vpop.f32.mrb[13].mxu1 }
 0x163   :  { %5526 = vtanh.f32 %v1435_v58  ;;  %v1352_v2 = vadd.f32 %v1351_v0, %v7158_v45  ;;  %v1441_v5 = vadd.f32 %v1440_v1, %v7158_v45 }
 0x164   :  { %5528 = vtanh.f32 %v1350_v62 }
 0x165   :  { %5530 = vtanh.f32 %v1439_v63  ;;  %v1355_v6 = vpop.f32.mrb[14].mxu0  ;;  %v1444_v7 = vpop.f32.mrb[14].mxu1 }
 0x166   :  { %v5513_v9 = vpop.eup %5512  ;;  %5532 = vtanh.f32 %v1352_v2  ;;  %v1356_v10 = vadd.f32 %v1355_v6, %v7168_v3  ;;  %v1445_v11 = vadd.f32 %v1444_v7, %v7168_v3  ;;  %v1357_v12 = vpop.f32.mrb[15].mxu0 }
 0x167   :  { %v1446_v13 = vpop.f32.mrb[15].mxu1  ;;  %v5515_v14 = vpop.eup %5514  ;;  %5534 = vtanh.f32 %v1441_v5  ;;  %v1358_v15 = vadd.f32 %v1357_v12, %v7168_v3 }
 0x168   :  { %v1447_v16 = vadd.f32 %v1446_v13, %v7168_v3  ;;  %v5517_v17 = vpop.eup %5516  ;;  %5536 = vtanh.f32 %v1356_v10 }
 0x169   :  { %v5519_v18 = vpop.eup %5518  ;;  %5538 = vtanh.f32 %v1445_v11 }
 0x16a   :  { %v5521_v19 = vpop.eup %5520  ;;  %5540 = vtanh.f32 %v1358_v15 }
 0x16b   :  { %v5523_v20 = vpop.eup %5522  ;;  %5542 = vtanh.f32 %v1447_v16  ;;  %v5300_v21 = vpack.c.bf16 %v5521_v19, %v5513_v9 }
 0x16c   :  { %v5525_v22 = vpop.eup %5524  ;;  %v5308_v23 = vpack.c.bf16 %v5523_v20, %v5515_v14 }
 0x16d   :  { %v5527_v24 = vpop.eup %5526  ;;  %v5298_v25 = vpack.c.bf16 %v5525_v22, %v5517_v17 }
 0x16e   :  { %v5529_v26 = vpop.eup %5528  ;;  %v5306_v27 = vpack.c.bf16 %v5527_v24, %v5519_v18 }
 0x16f   :  { %v5531_v28 = vpop.eup %5530  ;;  %5299 = vmatprep.subr.bf16.mxu0 %v5298_v25 }
 0x170   :  { %v5533_v29 = vpop.eup %5532  ;;  %5307 = vmatprep.subr.bf16.mxu1 %v5306_v27  ;;  %5301 = vmatpush1.bf16.msra.mxu0 %v5300_v21 }
 0x171   :  { %v5535_v30 = vpop.eup %5534  ;;  %5309 = vmatpush1.bf16.msra.mxu1 %v5308_v23 }
 0x172   :  { %v5537_v31 = vpop.eup %5536 }
 0x173   :  { %v5539_v32 = vpop.eup %5538  ;;  %v5304_v33 = vpack.c.bf16 %v5537_v31, %v5529_v26 }
 0x174   :  { %v5541_v34 = vpop.eup %5540  ;;  %v5312_v35 = vpack.c.bf16 %v5539_v32, %v5531_v28 }
 0x175   :  { %v5543_v36 = vpop.eup %5542  ;;  %v5302_v37 = vpack.c.bf16 %v5541_v34, %v5533_v29 }
 0x176   :  { %v5310_v41 = vpack.c.bf16 %v5543_v36, %v5535_v30 }
 0x177   :  { %5303 = vmatprep.subr.bf16.mxu0 %v5302_v37 }
 0x178   :  { %5311 = vmatprep.subr.bf16.mxu1 %v5310_v41  ;;  %5305 = vmatpush1.bf16.msra.mxu0 %v5304_v33 }
 0x179   :  { %5313 = vmatpush1.bf16.msra.mxu1 %v5312_v35 }
 0x17b   :  { %4506 = vmatmul.mubr.msk.f32.vlgmr.msra.gmra.mrb[40].mxu0 %vm1897_vm2, %v7177_v38 }
 0x17c   :  { %4510 = vmatmul.mubr.msk.f32.vlgmr.msra.gmra.mrb[40].mxu1 %vm1897_vm2, %v7177_v38  ;;  %2158 = vmatprep.mubr.f32.mxu0 %v5890_v4 }
 0x17d   :  { %2247 = vmatprep.mubr.f32.mxu1 %v5890_v4 }
 0x17f   :  { %4507 = vmatmul.mubr.msk.f32.gmra.mrb[42].mxu0 %vm1897_vm2, %v7187_v39 }
 0x180   :  { %4511 = vmatmul.mubr.msk.f32.gmra.mrb[42].mxu1 %vm1897_vm2, %v7187_v39  ;;  %2164 = vmatprep.mubr.f32.mxu0 %v5890_v4 }
 0x181   :  { %2253 = vmatprep.mubr.f32.mxu1 %v5890_v4 }
 0x183   :  { %4508 = vmatmul.mubr.msk.f32.gmra.mrb[44].mxu0 %vm1897_vm2, %v7198_v40 }
 0x184   :  { %4512 = vmatmul.mubr.msk.f32.gmra.mrb[44].mxu1 %vm1897_vm2, %v7198_v40  ;;  %2170 = vmatprep.mubr.f32.mxu0 %v5890_v4 }
 0x185   :  { %2259 = vmatprep.mubr.f32.mxu1 %v5890_v4 }
 0x187   :  { %4509 = vmatmul.mubr.msk.f32.gmra.mrb[46].mxu0 %vm1897_vm2, %v7209_v60 }
 0x188   :  { %4513 = vmatmul.mubr.msk.f32.gmra.mrb[46].mxu1 %vm1897_vm2, %v7209_v60  ;;  %2330 = vmatprep.mubr.f32.mxu0 %v5890_v4 }
 0x189   :  { %2419 = vmatprep.mubr.f32.mxu1 %v5890_v4 }
 0x199   :  { %v1515_v42 = vpop.f32.mrb[16].mxu0  ;;  %v1604_v43 = vpop.f32.mrb[16].mxu1 }
 0x19a   :  { %v1516_v44 = vadd.f32 %v1515_v42, %v7150_v57  ;;  %v1605_v46 = vadd.f32 %v1604_v43, %v7150_v57  ;;  %v1517_v47 = vpop.f32.mrb[17].mxu0  ;;  %v1606_v48 = vpop.f32.mrb[17].mxu1 }
 0x19b   :  { %v1518_v49 = vadd.f32 %v1517_v47, %v7150_v57  ;;  %v1607_v50 = vadd.f32 %v1606_v48, %v7150_v57 }
 0x19c   :  { %5544 = vtanh.f32 %v1516_v44 }
 0x19d   :  { %5546 = vtanh.f32 %v1605_v46  ;;  %v1521_v51 = vpop.f32.mrb[18].mxu0  ;;  %v1610_v52 = vpop.f32.mrb[18].mxu1 }
 0x19e   :  { %5548 = vtanh.f32 %v1518_v49  ;;  %v1522_v53 = vadd.f32 %v1521_v51, %v7156_v8  ;;  %v1611_v54 = vadd.f32 %v1610_v52, %v7156_v8  ;;  %v1523_v55 = vpop.f32.mrb[19].mxu0  ;;  %v1612_v56 = vpop.f32.mrb[19].mxu1 }
 0x19f   :  { %5550 = vtanh.f32 %v1607_v50  ;;  %v1524_v58 = vadd.f32 %v1523_v55, %v7156_v8  ;;  %v1613_v59 = vadd.f32 %v1612_v56, %v7156_v8 }
 0x1a0   :  { %5552 = vtanh.f32 %v1522_v53 }
 0x1a1   :  { %5554 = vtanh.f32 %v1611_v54  ;;  %v1527_v61 = vpop.f32.mrb[20].mxu0  ;;  %v1616_v62 = vpop.f32.mrb[20].mxu1 }
 0x1a2   :  { %5556 = vtanh.f32 %v1524_v58  ;;  %v1528_v63 = vadd.f32 %v1527_v61, %v7158_v45  ;;  %v1617_v0 = vadd.f32 %v1616_v62, %v7158_v45  ;;  %v1529_v1 = vpop.f32.mrb[21].mxu0  ;;  %v1618_v2 = vpop.f32.mrb[21].mxu1 }
 0x1a3   :  { %5558 = vtanh.f32 %v1613_v59  ;;  %v1530_v5 = vadd.f32 %v1529_v1, %v7158_v45  ;;  %v1619_v6 = vadd.f32 %v1618_v2, %v7158_v45 }
 0x1a4   :  { %5560 = vtanh.f32 %v1528_v63 }
 0x1a5   :  { %5562 = vtanh.f32 %v1617_v0  ;;  %v1533_v7 = vpop.f32.mrb[22].mxu0  ;;  %v1622_v9 = vpop.f32.mrb[22].mxu1 }
 0x1a6   :  { %v5545_v10 = vpop.eup %5544  ;;  %5564 = vtanh.f32 %v1530_v5  ;;  %v1534_v11 = vadd.f32 %v1533_v7, %v7168_v3  ;;  %v1623_v12 = vadd.f32 %v1622_v9, %v7168_v3  ;;  %v1535_v13 = vpop.f32.mrb[23].mxu0 }
 0x1a7   :  { %v1624_v14 = vpop.f32.mrb[23].mxu1  ;;  %v5547_v15 = vpop.eup %5546  ;;  %5566 = vtanh.f32 %v1619_v6  ;;  %v1536_v16 = vadd.f32 %v1535_v13, %v7168_v3 }
 0x1a8   :  { %v1625_v17 = vadd.f32 %v1624_v14, %v7168_v3  ;;  %v5549_v18 = vpop.eup %5548  ;;  %5568 = vtanh.f32 %v1534_v11 }
 0x1a9   :  { %v5551_v19 = vpop.eup %5550  ;;  %5570 = vtanh.f32 %v1623_v12 }
 0x1aa   :  { %v5553_v20 = vpop.eup %5552  ;;  %5572 = vtanh.f32 %v1536_v16 }
 0x1ab   :  { %v5555_v21 = vpop.eup %5554  ;;  %5574 = vtanh.f32 %v1625_v17  ;;  %v5316_v22 = vpack.c.bf16 %v5553_v20, %v5545_v10 }
 0x1ac   :  { %v5557_v23 = vpop.eup %5556  ;;  %v5324_v24 = vpack.c.bf16 %v5555_v21, %v5547_v15 }
 0x1ad   :  { %v5559_v25 = vpop.eup %5558  ;;  %v5314_v26 = vpack.c.bf16 %v5557_v23, %v5549_v18 }
 0x1ae   :  { %v5561_v27 = vpop.eup %5560  ;;  %v5322_v28 = vpack.c.bf16 %v5559_v25, %v5551_v19 }
 0x1af   :  { %v5563_v29 = vpop.eup %5562  ;;  %5315 = vmatprep.subr.bf16.mxu0 %v5314_v26 }
 0x1b0   :  { %v5565_v30 = vpop.eup %5564  ;;  %5323 = vmatprep.subr.bf16.mxu1 %v5322_v28  ;;  %5317 = vmatpush1.bf16.msra.mxu0 %v5316_v22 }
 0x1b1   :  { %v5567_v31 = vpop.eup %5566  ;;  %5325 = vmatpush1.bf16.msra.mxu1 %v5324_v24 }
 0x1b2   :  { %v5569_v32 = vpop.eup %5568 }
 0x1b3   :  { %v5571_v33 = vpop.eup %5570  ;;  %v5320_v34 = vpack.c.bf16 %v5569_v32, %v5561_v27 }
 0x1b4   :  { %v5573_v35 = vpop.eup %5572  ;;  %v5328_v36 = vpack.c.bf16 %v5571_v33, %v5563_v29 }
 0x1b5   :  { %v5575_v37 = vpop.eup %5574  ;;  %v5318_v41 = vpack.c.bf16 %v5573_v35, %v5565_v30 }
 0x1b6   :  { %v5326_v42 = vpack.c.bf16 %v5575_v37, %v5567_v31 }
 0x1b7   :  { %5319 = vmatprep.subr.bf16.mxu0 %v5318_v41 }
 0x1b8   :  { %5327 = vmatprep.subr.bf16.mxu1 %v5326_v42  ;;  %5321 = vmatpush1.bf16.msra.mxu0 %v5320_v34 }
 0x1b9   :  { %5329 = vmatpush1.bf16.msra.mxu1 %v5328_v36 }
 0x1bb   :  { %4514 = vmatmul.mubr.msk.f32.vlgmr.msra.gmra.mrb[48].mxu0 %vm1897_vm2, %v7177_v38 }
 0x1bc   :  { %4518 = vmatmul.mubr.msk.f32.vlgmr.msra.gmra.mrb[48].mxu1 %vm1897_vm2, %v7177_v38  ;;  %2336 = vmatprep.mubr.f32.mxu0 %v5890_v4 }
 0x1bd   :  { %2425 = vmatprep.mubr.f32.mxu1 %v5890_v4 }
 0x1bf   :  { %4515 = vmatmul.mubr.msk.f32.gmra.mrb[50].mxu0 %vm1897_vm2, %v7187_v39 }
 0x1c0   :  { %4519 = vmatmul.mubr.msk.f32.gmra.mrb[50].mxu1 %vm1897_vm2, %v7187_v39  ;;  %2342 = vmatprep.mubr.f32.mxu0 %v5890_v4 }
 0x1c1   :  { %2431 = vmatprep.mubr.f32.mxu1 %v5890_v4 }
 0x1c3   :  { %4516 = vmatmul.mubr.msk.f32.gmra.mrb[52].mxu0 %vm1897_vm2, %v7198_v40 }
 0x1c4   :  { %4520 = vmatmul.mubr.msk.f32.gmra.mrb[52].mxu1 %vm1897_vm2, %v7198_v40  ;;  %2348 = vmatprep.mubr.f32.mxu0 %v5890_v4 }
 0x1c5   :  { %2437 = vmatprep.mubr.f32.mxu1 %v5890_v4 }
 0x1c7   :  { %4517 = vmatmul.mubr.msk.f32.gmra.mrb[54].mxu0 %vm1897_vm2, %v7209_v60 }
 0x1c8   :  { %4521 = vmatmul.mubr.msk.f32.gmra.mrb[54].mxu1 %vm1897_vm2, %v7209_v60  ;;  %2508 = vmatprep.mubr.f32.mxu0 %v5890_v4 }
 0x1c9   :  { %2597 = vmatprep.mubr.f32.mxu1 %v5890_v4 }
 0x1d9   :  { %v1693_v43 = vpop.f32.mrb[24].mxu0  ;;  %v1782_v44 = vpop.f32.mrb[24].mxu1 }
 0x1da   :  { %v1694_v46 = vadd.f32 %v1693_v43, %v7150_v57  ;;  %v1783_v47 = vadd.f32 %v1782_v44, %v7150_v57  ;;  %v1695_v48 = vpop.f32.mrb[25].mxu0  ;;  %v1784_v49 = vpop.f32.mrb[25].mxu1 }
 0x1db   :  { %v1696_v50 = vadd.f32 %v1695_v48, %v7150_v57  ;;  %v1785_v51 = vadd.f32 %v1784_v49, %v7150_v57 }
 0x1dc   :  { %5576 = vtanh.f32 %v1694_v46 }
 0x1dd   :  { %5578 = vtanh.f32 %v1783_v47  ;;  %v1699_v52 = vpop.f32.mrb[26].mxu0  ;;  %v1788_v53 = vpop.f32.mrb[26].mxu1 }
 0x1de   :  { %5580 = vtanh.f32 %v1696_v50  ;;  %v1700_v54 = vadd.f32 %v1699_v52, %v7156_v8  ;;  %v1789_v55 = vadd.f32 %v1788_v53, %v7156_v8  ;;  %v1701_v56 = vpop.f32.mrb[27].mxu0  ;;  %v1790_v58 = vpop.f32.mrb[27].mxu1 }
 0x1df   :  { %5582 = vtanh.f32 %v1785_v51  ;;  %v1702_v59 = vadd.f32 %v1701_v56, %v7156_v8  ;;  %v1791_v61 = vadd.f32 %v1790_v58, %v7156_v8 }
 0x1e0   :  { %5584 = vtanh.f32 %v1700_v54 }
 0x1e1   :  { %5586 = vtanh.f32 %v1789_v55  ;;  %v1705_v62 = vpop.f32.mrb[28].mxu0  ;;  %v1794_v57 = vpop.f32.mrb[28].mxu1 }
 0x1e2   :  { %5588 = vtanh.f32 %v1702_v59  ;;  %v1706_v63 = vadd.f32 %v1705_v62, %v7158_v45  ;;  %v1795_v0 = vadd.f32 %v1794_v57, %v7158_v45  ;;  %v1707_v1 = vpop.f32.mrb[29].mxu0  ;;  %v1796_v2 = vpop.f32.mrb[29].mxu1 }
 0x1e3   :  { %5590 = vtanh.f32 %v1791_v61  ;;  %v1708_v5 = vadd.f32 %v1707_v1, %v7158_v45  ;;  %v1797_v6 = vadd.f32 %v1796_v2, %v7158_v45 }
 0x1e4   :  { %5592 = vtanh.f32 %v1706_v63 }
 0x1e5   :  { %5594 = vtanh.f32 %v1795_v0  ;;  %v1711_v7 = vpop.f32.mrb[30].mxu0  ;;  %v1800_v8 = vpop.f32.mrb[30].mxu1 }
 0x1e6   :  { %v5577_v9 = vpop.eup %5576  ;;  %5596 = vtanh.f32 %v1708_v5  ;;  %v1712_v10 = vadd.f32 %v1711_v7, %v7168_v3  ;;  %v1801_v11 = vadd.f32 %v1800_v8, %v7168_v3  ;;  %v1713_v12 = vpop.f32.mrb[31].mxu0 }
 0x1e7   :  { %v1802_v13 = vpop.f32.mrb[31].mxu1  ;;  %v5579_v14 = vpop.eup %5578  ;;  %5598 = vtanh.f32 %v1797_v6  ;;  %v1714_v15 = vadd.f32 %v1713_v12, %v7168_v3 }
 0x1e8   :  { %v1803_v16 = vadd.f32 %v1802_v13, %v7168_v3  ;;  %v5581_v17 = vpop.eup %5580  ;;  %5600 = vtanh.f32 %v1712_v10 }
 0x1e9   :  { %v5583_v45 = vpop.eup %5582  ;;  %5602 = vtanh.f32 %v1801_v11 }
 0x1ea   :  { %v5585_v18 = vpop.eup %5584  ;;  %5604 = vtanh.f32 %v1714_v15 }
 0x1eb   :  { %v5587_v19 = vpop.eup %5586  ;;  %5606 = vtanh.f32 %v1803_v16  ;;  %v5332_v20 = vpack.c.bf16 %v5585_v18, %v5577_v9 }
 0x1ec   :  { %v5589_v21 = vpop.eup %5588  ;;  %v5340_v22 = vpack.c.bf16 %v5587_v19, %v5579_v14 }
 0x1ed   :  { %v5591_v23 = vpop.eup %5590  ;;  %v5330_v24 = vpack.c.bf16 %v5589_v21, %v5581_v17 }
 0x1ee   :  { %v5593_v25 = vpop.eup %5592  ;;  %v5338_v26 = vpack.c.bf16 %v5591_v23, %v5583_v45 }
 0x1ef   :  { %v5595_v27 = vpop.eup %5594  ;;  %5331 = vmatprep.subr.bf16.mxu0 %v5330_v24 }
 0x1f0   :  { %v5597_v28 = vpop.eup %5596  ;;  %5339 = vmatprep.subr.bf16.mxu1 %v5338_v26  ;;  %5333 = vmatpush1.bf16.msra.mxu0 %v5332_v20 }
 0x1f1   :  { %v5599_v3 = vpop.eup %5598  ;;  %5341 = vmatpush1.bf16.msra.mxu1 %v5340_v22 }
 0x1f2   :  { %v5601_v29 = vpop.eup %5600 }
 0x1f3   :  { %v5603_v30 = vpop.eup %5602  ;;  %v5336_v31 = vpack.c.bf16 %v5601_v29, %v5593_v25 }
 0x1f4   :  { %v5605_v32 = vpop.eup %5604  ;;  %v5344_v33 = vpack.c.bf16 %v5603_v30, %v5595_v27 }
 0x1f5   :  { %v5607_v34 = vpop.eup %5606  ;;  %v5334_v35 = vpack.c.bf16 %v5605_v32, %v5597_v28 }
 0x1f6   :  { %v5342_v36 = vpack.c.bf16 %v5607_v34, %v5599_v3  ;;  %v7365_v34 = vld [vmem:[%s7643_s3 + $0x20] sm:$0xff] }
 0x1f7   :  { %5335 = vmatprep.subr.bf16.mxu0 %v5334_v35  ;;  %v7375_v35 = vld [vmem:[%s7643_s3 + $0x28] sm:$0xff] }
 0x1f8   :  { %5343 = vmatprep.subr.bf16.mxu1 %v5342_v36  ;;  %5337 = vmatpush1.bf16.msra.mxu0 %v5336_v31  ;;  %v7386_v36 = vld [vmem:[%s7643_s3 + $0x30] sm:$0xff] }
 0x1f9   :  { %5345 = vmatpush1.bf16.msra.mxu1 %v5344_v33 }
 0x1fb   :  { %4522 = vmatmul.mubr.msk.f32.vlgmr.msra.gmra.mrb[56].mxu0 %vm1897_vm2, %v7177_v38 }
 0x1fc   :  { %4526 = vmatmul.mubr.msk.f32.vlgmr.msra.gmra.mrb[56].mxu1 %vm1897_vm2, %v7177_v38  ;;  %2514 = vmatprep.mubr.f32.mxu0 %v5890_v4  ;;  %v7338_v38 = vpop.permute.xlu0 %1879 }
 0x1fd   :  { %2603 = vmatprep.mubr.f32.mxu1 %v5890_v4 }
 0x1ff   :  { %4523 = vmatmul.mubr.msk.f32.gmra.mrb[58].mxu0 %vm1897_vm2, %v7187_v39 }
 0x200   :  { %4527 = vmatmul.mubr.msk.f32.gmra.mrb[58].mxu1 %vm1897_vm2, %v7187_v39  ;;  %2520 = vmatprep.mubr.f32.mxu0 %v5890_v4  ;;  %v7350_v55 = vpop.permute.xlu0 %1889 }
 0x201   :  { %2609 = vmatprep.mubr.f32.mxu1 %v5890_v4 }
 0x203   :  { %4524 = vmatmul.mubr.msk.f32.gmra.mrb[60].mxu0 %vm1897_vm2, %v7198_v40 }
 0x204   :  { %4528 = vmatmul.mubr.msk.f32.gmra.mrb[60].mxu1 %vm1897_vm2, %v7198_v40  ;;  %2526 = vmatprep.mubr.f32.mxu0 %v5890_v4 }
 0x205   :  { %2615 = vmatprep.mubr.f32.mxu1 %v5890_v4 }
 0x207   :  { %4525 = vmatmul.mubr.msk.f32.gmra.mrb[62].mxu0 %vm1897_vm2, %v7209_v60 }
 0x208   :  { %4529 = vmatmul.mubr.msk.f32.gmra.mrb[62].mxu1 %vm1897_vm2, %v7209_v60  ;;  %2792 = vmatprep.mubr.f32.mxu0 %v5890_v4  ;;  %v7344_v60 = vpop.permute.xlu1 %1884 }
 0x209   :  { %2881 = vmatprep.mubr.f32.mxu1 %v5890_v4 }
 0x20c   :  { %v7356_v1 = vpop.permute.xlu1 %1894 }
 0x20d   :  { %v1976_v39 = vpop.f32.mrb[32].mxu0 }
 0x20e   :  { %v1977_v37 = vadd.f32 %v1976_v39, %v7338_v38  ;;  %v2065_v40 = vpop.f32.mrb[32].mxu1  ;;  %v1978_v41 = vpop.f32.mrb[33].mxu0  ;;  %v7397_v39 = vld [vmem:[%s7643_s3 + $0x38] sm:$0xff] }
 0x20f   :  { %v2066_v42 = vadd.f32 %v2065_v40, %v7338_v38  ;;  %v1979_v43 = vadd.f32 %v1978_v41, %v7338_v38  ;;  %v2067_v44 = vpop.f32.mrb[33].mxu1 }
 0x210   :  { %5608 = vtanh.f32 %v1977_v37  ;;  %v2068_v46 = vadd.f32 %v2067_v44, %v7338_v38 }
 0x211   :  { %5610 = vtanh.f32 %v2066_v42  ;;  %v1982_v47 = vpop.f32.mrb[34].mxu0 }
 0x212   :  { %5612 = vtanh.f32 %v1979_v43  ;;  %v1983_v48 = vadd.f32 %v1982_v47, %v7344_v60  ;;  %v2071_v49 = vpop.f32.mrb[34].mxu1  ;;  %v1984_v50 = vpop.f32.mrb[35].mxu0 }
 0x213   :  { %5614 = vtanh.f32 %v2068_v46  ;;  %v2072_v51 = vadd.f32 %v2071_v49, %v7344_v60  ;;  %v1985_v52 = vadd.f32 %v1984_v50, %v7344_v60  ;;  %v2073_v53 = vpop.f32.mrb[35].mxu1 }
 0x214   :  { %5616 = vtanh.f32 %v1983_v48  ;;  %v2074_v54 = vadd.f32 %v2073_v53, %v7344_v60 }
 0x215   :  { %5618 = vtanh.f32 %v2072_v51  ;;  %v1988_v56 = vpop.f32.mrb[36].mxu0 }
 0x216   :  { %5620 = vtanh.f32 %v1985_v52  ;;  %v1989_v58 = vadd.f32 %v1988_v56, %v7350_v55  ;;  %v2077_v59 = vpop.f32.mrb[36].mxu1  ;;  %v1990_v61 = vpop.f32.mrb[37].mxu0 }
 0x217   :  { %5622 = vtanh.f32 %v2074_v54  ;;  %v2078_v62 = vadd.f32 %v2077_v59, %v7350_v55  ;;  %v1991_v57 = vadd.f32 %v1990_v61, %v7350_v55  ;;  %v2079_v63 = vpop.f32.mrb[37].mxu1 }
 0x218   :  { %5624 = vtanh.f32 %v1989_v58  ;;  %v2080_v0 = vadd.f32 %v2079_v63, %v7350_v55 }
 0x219   :  { %5626 = vtanh.f32 %v2078_v62  ;;  %v1994_v2 = vpop.f32.mrb[38].mxu0 }
 0x21a   :  { %v5609_v5 = vpop.eup %5608  ;;  %5628 = vtanh.f32 %v1991_v57  ;;  %v1995_v6 = vadd.f32 %v1994_v2, %v7356_v1  ;;  %v2083_v7 = vpop.f32.mrb[38].mxu1 }
 0x21b   :  { %v1996_v8 = vpop.f32.mrb[39].mxu0  ;;  %v5611_v9 = vpop.eup %5610  ;;  %5630 = vtanh.f32 %v2080_v0  ;;  %v2084_v10 = vadd.f32 %v2083_v7, %v7356_v1 }
 0x21c   :  { %v1997_v11 = vadd.f32 %v1996_v8, %v7356_v1  ;;  %v2085_v12 = vpop.f32.mrb[39].mxu1  ;;  %v5613_v13 = vpop.eup %5612  ;;  %5632 = vtanh.f32 %v1995_v6 }
 0x21d   :  { %v2086_v14 = vadd.f32 %v2085_v12, %v7356_v1  ;;  %v5615_v15 = vpop.eup %5614  ;;  %5634 = vtanh.f32 %v2084_v10 }
 0x21e   :  { %v5617_v16 = vpop.eup %5616  ;;  %5636 = vtanh.f32 %v1997_v11 }
 0x21f   :  { %v5619_v17 = vpop.eup %5618  ;;  %5638 = vtanh.f32 %v2086_v14  ;;  %v5348_v45 = vpack.c.bf16 %v5617_v16, %v5609_v5 }
 0x220   :  { %v5621_v18 = vpop.eup %5620  ;;  %v5356_v19 = vpack.c.bf16 %v5619_v17, %v5611_v9 }
 0x221   :  { %v5623_v20 = vpop.eup %5622  ;;  %v5346_v21 = vpack.c.bf16 %v5621_v18, %v5613_v13 }
 0x222   :  { %v5625_v22 = vpop.eup %5624  ;;  %v5354_v23 = vpack.c.bf16 %v5623_v20, %v5615_v15 }
 0x223   :  { %v5627_v24 = vpop.eup %5626  ;;  %5347 = vmatprep.subr.bf16.mxu0 %v5346_v21 }
 0x224   :  { %v5629_v25 = vpop.eup %5628  ;;  %5355 = vmatprep.subr.bf16.mxu1 %v5354_v23  ;;  %5349 = vmatpush1.bf16.msra.mxu0 %v5348_v45 }
 0x225   :  { %v5631_v26 = vpop.eup %5630  ;;  %5357 = vmatpush1.bf16.msra.mxu1 %v5356_v19 }
 0x226   :  { %v5633_v27 = vpop.eup %5632 }
 0x227   :  { %v5635_v28 = vpop.eup %5634  ;;  %v5352_v3 = vpack.c.bf16 %v5633_v27, %v5625_v22 }
 0x228   :  { %v5637_v29 = vpop.eup %5636  ;;  %v5360_v30 = vpack.c.bf16 %v5635_v28, %v5627_v24 }
 0x229   :  { %v5639_v31 = vpop.eup %5638  ;;  %v5350_v32 = vpack.c.bf16 %v5637_v29, %v5629_v25 }
 0x22a   :  { %v5358_v33 = vpack.c.bf16 %v5639_v31, %v5631_v26 }
 0x22b   :  { %5351 = vmatprep.subr.bf16.mxu0 %v5350_v32 }
 0x22c   :  { %5359 = vmatprep.subr.bf16.mxu1 %v5358_v33  ;;  %5353 = vmatpush1.bf16.msra.mxu0 %v5352_v3 }
 0x22d   :  { %5361 = vmatpush1.bf16.msra.mxu1 %v5360_v30 }
 0x22f   :  { %4538 = vmatmul.mubr.msk.f32.vlgmr.msra.gmra.mrb[64].mxu0 %vm1897_vm2, %v7365_v34 }
 0x230   :  { %4542 = vmatmul.mubr.msk.f32.vlgmr.msra.gmra.mrb[64].mxu1 %vm1897_vm2, %v7365_v34  ;;  %2798 = vmatprep.mubr.f32.mxu0 %v5890_v4 }
 0x231   :  { %2887 = vmatprep.mubr.f32.mxu1 %v5890_v4 }
 0x233   :  { %4539 = vmatmul.mubr.msk.f32.gmra.mrb[66].mxu0 %vm1897_vm2, %v7375_v35 }
 0x234   :  { %4543 = vmatmul.mubr.msk.f32.gmra.mrb[66].mxu1 %vm1897_vm2, %v7375_v35  ;;  %2804 = vmatprep.mubr.f32.mxu0 %v5890_v4 }
 0x235   :  { %2893 = vmatprep.mubr.f32.mxu1 %v5890_v4 }
 0x237   :  { %4540 = vmatmul.mubr.msk.f32.gmra.mrb[68].mxu0 %vm1897_vm2, %v7386_v36 }
 0x238   :  { %4544 = vmatmul.mubr.msk.f32.gmra.mrb[68].mxu1 %vm1897_vm2, %v7386_v36  ;;  %2810 = vmatprep.mubr.f32.mxu0 %v5890_v4 }
 0x239   :  { %2899 = vmatprep.mubr.f32.mxu1 %v5890_v4 }
 0x23b   :  { %4541 = vmatmul.mubr.msk.f32.gmra.mrb[70].mxu0 %vm1897_vm2, %v7397_v39 }
 0x23c   :  { %4545 = vmatmul.mubr.msk.f32.gmra.mrb[70].mxu1 %vm1897_vm2, %v7397_v39  ;;  %2970 = vmatprep.mubr.f32.mxu0 %v5890_v4 }
 0x23d   :  { %3059 = vmatprep.mubr.f32.mxu1 %v5890_v4 }
 0x24e   :  { %v2154_v37 = vpop.f32.mrb[40].mxu0 }
 0x24f   :  { %v2155_v40 = vadd.f32 %v2154_v37, %v7338_v38  ;;  %v2243_v41 = vpop.f32.mrb[40].mxu1  ;;  %v2156_v42 = vpop.f32.mrb[41].mxu0 }
 0x250   :  { %v2244_v43 = vadd.f32 %v2243_v41, %v7338_v38  ;;  %v2157_v44 = vadd.f32 %v2156_v42, %v7338_v38  ;;  %v2245_v46 = vpop.f32.mrb[41].mxu1 }
 0x251   :  { %5640 = vtanh.f32 %v2155_v40  ;;  %v2246_v47 = vadd.f32 %v2245_v46, %v7338_v38 }
 0x252   :  { %5642 = vtanh.f32 %v2244_v43  ;;  %v2160_v48 = vpop.f32.mrb[42].mxu0 }
 0x253   :  { %5644 = vtanh.f32 %v2157_v44  ;;  %v2161_v49 = vadd.f32 %v2160_v48, %v7344_v60  ;;  %v2249_v50 = vpop.f32.mrb[42].mxu1  ;;  %v2162_v51 = vpop.f32.mrb[43].mxu0 }
 0x254   :  { %5646 = vtanh.f32 %v2246_v47  ;;  %v2250_v52 = vadd.f32 %v2249_v50, %v7344_v60  ;;  %v2163_v53 = vadd.f32 %v2162_v51, %v7344_v60  ;;  %v2251_v54 = vpop.f32.mrb[43].mxu1 }
 0x255   :  { %5648 = vtanh.f32 %v2161_v49  ;;  %v2252_v56 = vadd.f32 %v2251_v54, %v7344_v60 }
 0x256   :  { %5650 = vtanh.f32 %v2250_v52  ;;  %v2166_v58 = vpop.f32.mrb[44].mxu0 }
 0x257   :  { %5652 = vtanh.f32 %v2163_v53  ;;  %v2167_v59 = vadd.f32 %v2166_v58, %v7350_v55  ;;  %v2255_v61 = vpop.f32.mrb[44].mxu1  ;;  %v2168_v62 = vpop.f32.mrb[45].mxu0 }
 0x258   :  { %5654 = vtanh.f32 %v2252_v56  ;;  %v2256_v57 = vadd.f32 %v2255_v61, %v7350_v55  ;;  %v2169_v63 = vadd.f32 %v2168_v62, %v7350_v55  ;;  %v2257_v0 = vpop.f32.mrb[45].mxu1 }
 0x259   :  { %5656 = vtanh.f32 %v2167_v59  ;;  %v2258_v2 = vadd.f32 %v2257_v0, %v7350_v55 }
 0x25a   :  { %5658 = vtanh.f32 %v2256_v57  ;;  %v2172_v5 = vpop.f32.mrb[46].mxu0 }
 0x25b   :  { %v5641_v6 = vpop.eup %5640  ;;  %5660 = vtanh.f32 %v2169_v63  ;;  %v2173_v7 = vadd.f32 %v2172_v5, %v7356_v1  ;;  %v2261_v8 = vpop.f32.mrb[46].mxu1 }
 0x25c   :  { %v2174_v9 = vpop.f32.mrb[47].mxu0  ;;  %v5643_v10 = vpop.eup %5642  ;;  %5662 = vtanh.f32 %v2258_v2  ;;  %v2262_v11 = vadd.f32 %v2261_v8, %v7356_v1 }
 0x25d   :  { %v2175_v12 = vadd.f32 %v2174_v9, %v7356_v1  ;;  %v2263_v13 = vpop.f32.mrb[47].mxu1  ;;  %v5645_v14 = vpop.eup %5644  ;;  %5664 = vtanh.f32 %v2173_v7 }
 0x25e   :  { %v2264_v15 = vadd.f32 %v2263_v13, %v7356_v1  ;;  %v5647_v16 = vpop.eup %5646  ;;  %5666 = vtanh.f32 %v2262_v11 }
 0x25f   :  { %v5649_v17 = vpop.eup %5648  ;;  %5668 = vtanh.f32 %v2175_v12 }
 0x260   :  { %v5651_v45 = vpop.eup %5650  ;;  %5670 = vtanh.f32 %v2264_v15  ;;  %v5364_v18 = vpack.c.bf16 %v5649_v17, %v5641_v6 }
 0x261   :  { %v5653_v19 = vpop.eup %5652  ;;  %v5372_v20 = vpack.c.bf16 %v5651_v45, %v5643_v10 }
 0x262   :  { %v5655_v21 = vpop.eup %5654  ;;  %v5362_v22 = vpack.c.bf16 %v5653_v19, %v5645_v14 }
 0x263   :  { %v5657_v23 = vpop.eup %5656  ;;  %v5370_v24 = vpack.c.bf16 %v5655_v21, %v5647_v16 }
 0x264   :  { %v5659_v25 = vpop.eup %5658  ;;  %5363 = vmatprep.subr.bf16.mxu0 %v5362_v22 }
 0x265   :  { %v5661_v26 = vpop.eup %5660  ;;  %5371 = vmatprep.subr.bf16.mxu1 %v5370_v24  ;;  %5365 = vmatpush1.bf16.msra.mxu0 %v5364_v18 }
 0x266   :  { %v5663_v27 = vpop.eup %5662  ;;  %5373 = vmatpush1.bf16.msra.mxu1 %v5372_v20 }
 0x267   :  { %v5665_v28 = vpop.eup %5664 }
 0x268   :  { %v5667_v3 = vpop.eup %5666  ;;  %v5368_v29 = vpack.c.bf16 %v5665_v28, %v5657_v23 }
 0x269   :  { %v5669_v30 = vpop.eup %5668  ;;  %v5376_v31 = vpack.c.bf16 %v5667_v3, %v5659_v25 }
 0x26a   :  { %v5671_v32 = vpop.eup %5670  ;;  %v5366_v33 = vpack.c.bf16 %v5669_v30, %v5661_v26 }
 0x26b   :  { %v5374_v37 = vpack.c.bf16 %v5671_v32, %v5663_v27 }
 0x26c   :  { %5367 = vmatprep.subr.bf16.mxu0 %v5366_v33 }
 0x26d   :  { %5375 = vmatprep.subr.bf16.mxu1 %v5374_v37  ;;  %5369 = vmatpush1.bf16.msra.mxu0 %v5368_v29 }
 0x26e   :  { %5377 = vmatpush1.bf16.msra.mxu1 %v5376_v31 }
 0x270   :  { %4546 = vmatmul.mubr.msk.f32.vlgmr.msra.gmra.mrb[72].mxu0 %vm1897_vm2, %v7365_v34 }
 0x271   :  { %4550 = vmatmul.mubr.msk.f32.vlgmr.msra.gmra.mrb[72].mxu1 %vm1897_vm2, %v7365_v34  ;;  %2976 = vmatprep.mubr.f32.mxu0 %v5890_v4 }
 0x272   :  { %3065 = vmatprep.mubr.f32.mxu1 %v5890_v4 }
 0x274   :  { %4547 = vmatmul.mubr.msk.f32.gmra.mrb[74].mxu0 %vm1897_vm2, %v7375_v35 }
 0x275   :  { %4551 = vmatmul.mubr.msk.f32.gmra.mrb[74].mxu1 %vm1897_vm2, %v7375_v35  ;;  %2982 = vmatprep.mubr.f32.mxu0 %v5890_v4 }
 0x276   :  { %3071 = vmatprep.mubr.f32.mxu1 %v5890_v4 }
 0x278   :  { %4548 = vmatmul.mubr.msk.f32.gmra.mrb[76].mxu0 %vm1897_vm2, %v7386_v36 }
 0x279   :  { %4552 = vmatmul.mubr.msk.f32.gmra.mrb[76].mxu1 %vm1897_vm2, %v7386_v36  ;;  %2988 = vmatprep.mubr.f32.mxu0 %v5890_v4 }
 0x27a   :  { %3077 = vmatprep.mubr.f32.mxu1 %v5890_v4 }
 0x27c   :  { %4549 = vmatmul.mubr.msk.f32.gmra.mrb[78].mxu0 %vm1897_vm2, %v7397_v39 }
 0x27d   :  { %4553 = vmatmul.mubr.msk.f32.gmra.mrb[78].mxu1 %vm1897_vm2, %v7397_v39  ;;  %3148 = vmatprep.mubr.f32.mxu0 %v5890_v4 }
 0x27e   :  { %3237 = vmatprep.mubr.f32.mxu1 %v5890_v4 }
 0x28e   :  { %v2332_v40 = vpop.f32.mrb[48].mxu0 }
 0x28f   :  { %v2333_v41 = vadd.f32 %v2332_v40, %v7338_v38  ;;  %v2421_v42 = vpop.f32.mrb[48].mxu1  ;;  %v2334_v43 = vpop.f32.mrb[49].mxu0 }
 0x290   :  { %v2422_v44 = vadd.f32 %v2421_v42, %v7338_v38  ;;  %v2335_v46 = vadd.f32 %v2334_v43, %v7338_v38  ;;  %v2423_v47 = vpop.f32.mrb[49].mxu1 }
 0x291   :  { %5672 = vtanh.f32 %v2333_v41  ;;  %v2424_v48 = vadd.f32 %v2423_v47, %v7338_v38 }
 0x292   :  { %5674 = vtanh.f32 %v2422_v44  ;;  %v2338_v49 = vpop.f32.mrb[50].mxu0 }
 0x293   :  { %5676 = vtanh.f32 %v2335_v46  ;;  %v2339_v50 = vadd.f32 %v2338_v49, %v7344_v60  ;;  %v2427_v51 = vpop.f32.mrb[50].mxu1  ;;  %v2340_v52 = vpop.f32.mrb[51].mxu0 }
 0x294   :  { %5678 = vtanh.f32 %v2424_v48  ;;  %v2428_v53 = vadd.f32 %v2427_v51, %v7344_v60  ;;  %v2341_v54 = vadd.f32 %v2340_v52, %v7344_v60  ;;  %v2429_v56 = vpop.f32.mrb[51].mxu1 }
 0x295   :  { %5680 = vtanh.f32 %v2339_v50  ;;  %v2430_v58 = vadd.f32 %v2429_v56, %v7344_v60 }
 0x296   :  { %5682 = vtanh.f32 %v2428_v53  ;;  %v2344_v59 = vpop.f32.mrb[52].mxu0 }
 0x297   :  { %5684 = vtanh.f32 %v2341_v54  ;;  %v2345_v61 = vadd.f32 %v2344_v59, %v7350_v55  ;;  %v2433_v62 = vpop.f32.mrb[52].mxu1  ;;  %v2346_v57 = vpop.f32.mrb[53].mxu0 }
 0x298   :  { %5686 = vtanh.f32 %v2430_v58  ;;  %v2434_v63 = vadd.f32 %v2433_v62, %v7350_v55  ;;  %v2347_v0 = vadd.f32 %v2346_v57, %v7350_v55  ;;  %v2435_v2 = vpop.f32.mrb[53].mxu1 }
 0x299   :  { %5688 = vtanh.f32 %v2345_v61  ;;  %v2436_v5 = vadd.f32 %v2435_v2, %v7350_v55 }
 0x29a   :  { %5690 = vtanh.f32 %v2434_v63  ;;  %v2350_v6 = vpop.f32.mrb[54].mxu0 }
 0x29b   :  { %v5673_v7 = vpop.eup %5672  ;;  %5692 = vtanh.f32 %v2347_v0  ;;  %v2351_v8 = vadd.f32 %v2350_v6, %v7356_v1  ;;  %v2439_v9 = vpop.f32.mrb[54].mxu1 }
 0x29c   :  { %v2352_v10 = vpop.f32.mrb[55].mxu0  ;;  %v5675_v11 = vpop.eup %5674  ;;  %5694 = vtanh.f32 %v2436_v5  ;;  %v2440_v12 = vadd.f32 %v2439_v9, %v7356_v1 }
 0x29d   :  { %v2353_v13 = vadd.f32 %v2352_v10, %v7356_v1  ;;  %v2441_v14 = vpop.f32.mrb[55].mxu1  ;;  %v5677_v15 = vpop.eup %5676  ;;  %5696 = vtanh.f32 %v2351_v8 }
 0x29e   :  { %v2442_v16 = vadd.f32 %v2441_v14, %v7356_v1  ;;  %v5679_v17 = vpop.eup %5678  ;;  %5698 = vtanh.f32 %v2440_v12 }
 0x29f   :  { %v5681_v45 = vpop.eup %5680  ;;  %5700 = vtanh.f32 %v2353_v13 }
 0x2a0   :  { %v5683_v18 = vpop.eup %5682  ;;  %5702 = vtanh.f32 %v2442_v16  ;;  %v5380_v19 = vpack.c.bf16 %v5681_v45, %v5673_v7 }
 0x2a1   :  { %v5685_v20 = vpop.eup %5684  ;;  %v5388_v21 = vpack.c.bf16 %v5683_v18, %v5675_v11 }
 0x2a2   :  { %v5687_v22 = vpop.eup %5686  ;;  %v5378_v23 = vpack.c.bf16 %v5685_v20, %v5677_v15 }
 0x2a3   :  { %v5689_v24 = vpop.eup %5688  ;;  %v5386_v25 = vpack.c.bf16 %v5687_v22, %v5679_v17 }
 0x2a4   :  { %v5691_v26 = vpop.eup %5690  ;;  %5379 = vmatprep.subr.bf16.mxu0 %v5378_v23 }
 0x2a5   :  { %v5693_v27 = vpop.eup %5692  ;;  %5387 = vmatprep.subr.bf16.mxu1 %v5386_v25  ;;  %5381 = vmatpush1.bf16.msra.mxu0 %v5380_v19 }
 0x2a6   :  { %v5695_v28 = vpop.eup %5694  ;;  %5389 = vmatpush1.bf16.msra.mxu1 %v5388_v21 }
 0x2a7   :  { %v5697_v3 = vpop.eup %5696 }
 0x2a8   :  { %v5699_v29 = vpop.eup %5698  ;;  %v5384_v30 = vpack.c.bf16 %v5697_v3, %v5689_v24 }
 0x2a9   :  { %v5701_v31 = vpop.eup %5700  ;;  %v5392_v32 = vpack.c.bf16 %v5699_v29, %v5691_v26 }
 0x2aa   :  { %v5703_v33 = vpop.eup %5702  ;;  %v5382_v37 = vpack.c.bf16 %v5701_v31, %v5693_v27 }
 0x2ab   :  { %v5390_v40 = vpack.c.bf16 %v5703_v33, %v5695_v28 }
 0x2ac   :  { %5383 = vmatprep.subr.bf16.mxu0 %v5382_v37 }
 0x2ad   :  { %5391 = vmatprep.subr.bf16.mxu1 %v5390_v40  ;;  %5385 = vmatpush1.bf16.msra.mxu0 %v5384_v30 }
 0x2ae   :  { %5393 = vmatpush1.bf16.msra.mxu1 %v5392_v32 }
 0x2b0   :  { %4554 = vmatmul.mubr.msk.f32.vlgmr.msra.gmra.mrb[80].mxu0 %vm1897_vm2, %v7365_v34 }
 0x2b1   :  { %4558 = vmatmul.mubr.msk.f32.vlgmr.msra.gmra.mrb[80].mxu1 %vm1897_vm2, %v7365_v34  ;;  %3154 = vmatprep.mubr.f32.mxu0 %v5890_v4 }
 0x2b2   :  { %3243 = vmatprep.mubr.f32.mxu1 %v5890_v4 }
 0x2b4   :  { %4555 = vmatmul.mubr.msk.f32.gmra.mrb[82].mxu0 %vm1897_vm2, %v7375_v35 }
 0x2b5   :  { %4559 = vmatmul.mubr.msk.f32.gmra.mrb[82].mxu1 %vm1897_vm2, %v7375_v35  ;;  %3160 = vmatprep.mubr.f32.mxu0 %v5890_v4 }
 0x2b6   :  { %3249 = vmatprep.mubr.f32.mxu1 %v5890_v4 }
 0x2b8   :  { %4556 = vmatmul.mubr.msk.f32.gmra.mrb[84].mxu0 %vm1897_vm2, %v7386_v36 }
 0x2b9   :  { %4560 = vmatmul.mubr.msk.f32.gmra.mrb[84].mxu1 %vm1897_vm2, %v7386_v36  ;;  %3166 = vmatprep.mubr.f32.mxu0 %v5890_v4 }
 0x2ba   :  { %3255 = vmatprep.mubr.f32.mxu1 %v5890_v4 }
 0x2bc   :  { %4557 = vmatmul.mubr.msk.f32.gmra.mrb[86].mxu0 %vm1897_vm2, %v7397_v39 }
 0x2bd   :  { %4561 = vmatmul.mubr.msk.f32.gmra.mrb[86].mxu1 %vm1897_vm2, %v7397_v39  ;;  %3326 = vmatprep.mubr.f32.mxu0 %v5890_v4 }
 0x2be   :  { %3415 = vmatprep.mubr.f32.mxu1 %v5890_v4 }
 0x2ce   :  { %v2510_v41 = vpop.f32.mrb[56].mxu0 }
 0x2cf   :  { %v2511_v42 = vadd.f32 %v2510_v41, %v7338_v38  ;;  %v2599_v43 = vpop.f32.mrb[56].mxu1  ;;  %v2512_v44 = vpop.f32.mrb[57].mxu0 }
 0x2d0   :  { %v2600_v46 = vadd.f32 %v2599_v43, %v7338_v38  ;;  %v2513_v47 = vadd.f32 %v2512_v44, %v7338_v38  ;;  %v2601_v48 = vpop.f32.mrb[57].mxu1 }
 0x2d1   :  { %5704 = vtanh.f32 %v2511_v42  ;;  %v2602_v49 = vadd.f32 %v2601_v48, %v7338_v38 }
 0x2d2   :  { %5706 = vtanh.f32 %v2600_v46  ;;  %v2516_v50 = vpop.f32.mrb[58].mxu0 }
 0x2d3   :  { %5708 = vtanh.f32 %v2513_v47  ;;  %v2517_v51 = vadd.f32 %v2516_v50, %v7344_v60  ;;  %v2605_v52 = vpop.f32.mrb[58].mxu1  ;;  %v2518_v53 = vpop.f32.mrb[59].mxu0 }
 0x2d4   :  { %5710 = vtanh.f32 %v2602_v49  ;;  %v2606_v54 = vadd.f32 %v2605_v52, %v7344_v60  ;;  %v2519_v56 = vadd.f32 %v2518_v53, %v7344_v60  ;;  %v2607_v58 = vpop.f32.mrb[59].mxu1 }
 0x2d5   :  { %5712 = vtanh.f32 %v2517_v51  ;;  %v2608_v59 = vadd.f32 %v2607_v58, %v7344_v60 }
 0x2d6   :  { %5714 = vtanh.f32 %v2606_v54  ;;  %v2522_v61 = vpop.f32.mrb[60].mxu0 }
 0x2d7   :  { %5716 = vtanh.f32 %v2519_v56  ;;  %v2523_v38 = vadd.f32 %v2522_v61, %v7350_v55  ;;  %v2611_v62 = vpop.f32.mrb[60].mxu1  ;;  %v2524_v57 = vpop.f32.mrb[61].mxu0 }
 0x2d8   :  { %5718 = vtanh.f32 %v2608_v59  ;;  %v2612_v63 = vadd.f32 %v2611_v62, %v7350_v55  ;;  %v2525_v0 = vadd.f32 %v2524_v57, %v7350_v55  ;;  %v2613_v2 = vpop.f32.mrb[61].mxu1 }
 0x2d9   :  { %5720 = vtanh.f32 %v2523_v38  ;;  %v2614_v5 = vadd.f32 %v2613_v2, %v7350_v55 }
 0x2da   :  { %5722 = vtanh.f32 %v2612_v63  ;;  %v2528_v6 = vpop.f32.mrb[62].mxu0 }
 0x2db   :  { %v5705_v7 = vpop.eup %5704  ;;  %5724 = vtanh.f32 %v2525_v0  ;;  %v2529_v60 = vadd.f32 %v2528_v6, %v7356_v1  ;;  %v2617_v8 = vpop.f32.mrb[62].mxu1 }
 0x2dc   :  { %v2530_v9 = vpop.f32.mrb[63].mxu0  ;;  %v5707_v10 = vpop.eup %5706  ;;  %5726 = vtanh.f32 %v2614_v5  ;;  %v2618_v11 = vadd.f32 %v2617_v8, %v7356_v1 }
 0x2dd   :  { %v2531_v12 = vadd.f32 %v2530_v9, %v7356_v1  ;;  %v2619_v13 = vpop.f32.mrb[63].mxu1  ;;  %v5709_v14 = vpop.eup %5708  ;;  %5728 = vtanh.f32 %v2529_v60 }
 0x2de   :  { %v2620_v15 = vadd.f32 %v2619_v13, %v7356_v1  ;;  %v5711_v55 = vpop.eup %5710  ;;  %5730 = vtanh.f32 %v2618_v11 }
 0x2df   :  { %v5713_v16 = vpop.eup %5712  ;;  %5732 = vtanh.f32 %v2531_v12 }
 0x2e0   :  { %v5715_v17 = vpop.eup %5714  ;;  %5734 = vtanh.f32 %v2620_v15  ;;  %v5396_v45 = vpack.c.bf16 %v5713_v16, %v5705_v7 }
 0x2e1   :  { %v5717_v18 = vpop.eup %5716  ;;  %v5404_v19 = vpack.c.bf16 %v5715_v17, %v5707_v10 }
 0x2e2   :  { %v5719_v20 = vpop.eup %5718  ;;  %v5394_v21 = vpack.c.bf16 %v5717_v18, %v5709_v14 }
 0x2e3   :  { %v5721_v22 = vpop.eup %5720  ;;  %v5402_v23 = vpack.c.bf16 %v5719_v20, %v5711_v55 }
 0x2e4   :  { %v5723_v24 = vpop.eup %5722  ;;  %5395 = vmatprep.subr.bf16.mxu0 %v5394_v21 }
 0x2e5   :  { %v5725_v25 = vpop.eup %5724  ;;  %5403 = vmatprep.subr.bf16.mxu1 %v5402_v23  ;;  %5397 = vmatpush1.bf16.msra.mxu0 %v5396_v45 }
 0x2e6   :  { %v5727_v26 = vpop.eup %5726  ;;  %5405 = vmatpush1.bf16.msra.mxu1 %v5404_v19 }
 0x2e7   :  { %v5729_v1 = vpop.eup %5728 }
 0x2e8   :  { %v5731_v27 = vpop.eup %5730  ;;  %v5400_v28 = vpack.c.bf16 %v5729_v1, %v5721_v22 }
 0x2e9   :  { %v5733_v3 = vpop.eup %5732  ;;  %v5408_v29 = vpack.c.bf16 %v5731_v27, %v5723_v24 }
 0x2ea   :  { %v5735_v30 = vpop.eup %5734  ;;  %v5398_v31 = vpack.c.bf16 %v5733_v3, %v5725_v25 }
 0x2eb   :  { %v5406_v32 = vpack.c.bf16 %v5735_v30, %v5727_v26  ;;  %v7553_v30 = vld [vmem:[%s7645_s5] sm:$0x1] }
 0x2ec   :  { %5399 = vmatprep.subr.bf16.mxu0 %v5398_v31 }
 0x2ed   :  { %5407 = vmatprep.subr.bf16.mxu1 %v5406_v32  ;;  %5401 = vmatpush1.bf16.msra.mxu0 %v5400_v28 }
 0x2ee   :  { %5409 = vmatpush1.bf16.msra.mxu1 %v5408_v29 }
 0x2f0   :  { %4562 = vmatmul.mubr.msk.f32.vlgmr.msra.gmra.mrb[88].mxu0 %vm1897_vm2, %v7365_v34 }
 0x2f1   :  { %4566 = vmatmul.mubr.msk.f32.vlgmr.msra.gmra.mrb[88].mxu1 %vm1897_vm2, %v7365_v34  ;;  %3332 = vmatprep.mubr.f32.mxu0 %v5890_v4  ;;  %v7526_v34 = vpop.permute.xlu0 %2698 }
 0x2f2   :  { %3421 = vmatprep.mubr.f32.mxu1 %v5890_v4 }
 0x2f4   :  { %4563 = vmatmul.mubr.msk.f32.gmra.mrb[90].mxu0 %vm1897_vm2, %v7375_v35 }
 0x2f5   :  { %4567 = vmatmul.mubr.msk.f32.gmra.mrb[90].mxu1 %vm1897_vm2, %v7375_v35  ;;  %3338 = vmatprep.mubr.f32.mxu0 %v5890_v4  ;;  %v7538_v53 = vpop.permute.xlu0 %2708 }
 0x2f6   :  { %3427 = vmatprep.mubr.f32.mxu1 %v5890_v4 }
 0x2f8   :  { %4564 = vmatmul.mubr.msk.f32.gmra.mrb[92].mxu0 %vm1897_vm2, %v7386_v36 }
 0x2f9   :  { %4568 = vmatmul.mubr.msk.f32.gmra.mrb[92].mxu1 %vm1897_vm2, %v7386_v36  ;;  %3344 = vmatprep.mubr.f32.mxu0 %v5890_v4 }
 0x2fa   :  { %3433 = vmatprep.mubr.f32.mxu1 %v5890_v4 }
 0x2fc   :  { %4565 = vmatmul.mubr.msk.f32.gmra.mrb[94].mxu0 %vm1897_vm2, %v7397_v39 }
 0x2fd   :  { %4569 = vmatmul.mubr.msk.f32.gmra.mrb[94].mxu1 %vm1897_vm2, %v7397_v39  ;;  %3574 = vmatprep.mubr.f32.mxu0 %v5890_v4  ;;  %v7532_v39 = vpop.permute.xlu1 %2703 }
 0x2fe   :  { %3645 = vmatprep.mubr.f32.mxu1 %v5890_v4 }
 0x301   :  { %v7544_v63 = vpop.permute.xlu1 %2713 }
 0x302   :  { %v2794_v35 = vpop.f32.mrb[64].mxu0 }
 0x303   :  { %v2795_v33 = vadd.f32 %v2794_v35, %v7526_v34  ;;  %v2883_v36 = vpop.f32.mrb[64].mxu1  ;;  %v2796_v37 = vpop.f32.mrb[65].mxu0 }
 0x304   :  { %v2884_v40 = vadd.f32 %v2883_v36, %v7526_v34  ;;  %v2797_v41 = vadd.f32 %v2796_v37, %v7526_v34  ;;  %v2885_v42 = vpop.f32.mrb[65].mxu1 }
 0x305   :  { %5736 = vtanh.f32 %v2795_v33  ;;  %v2886_v43 = vadd.f32 %v2885_v42, %v7526_v34 }
 0x306   :  { %5738 = vtanh.f32 %v2884_v40  ;;  %v2800_v44 = vpop.f32.mrb[66].mxu0 }
 0x307   :  { %5740 = vtanh.f32 %v2797_v41  ;;  %v2801_v46 = vadd.f32 %v2800_v44, %v7532_v39  ;;  %v2889_v47 = vpop.f32.mrb[66].mxu1  ;;  %v2802_v48 = vpop.f32.mrb[67].mxu0 }
 0x308   :  { %5742 = vtanh.f32 %v2886_v43  ;;  %v2890_v49 = vadd.f32 %v2889_v47, %v7532_v39  ;;  %v2803_v50 = vadd.f32 %v2802_v48, %v7532_v39  ;;  %v2891_v51 = vpop.f32.mrb[67].mxu1 }
 0x309   :  { %5744 = vtanh.f32 %v2801_v46  ;;  %v2892_v52 = vadd.f32 %v2891_v51, %v7532_v39 }
 0x30a   :  { %5746 = vtanh.f32 %v2890_v49  ;;  %v2806_v54 = vpop.f32.mrb[68].mxu0 }
 0x30b   :  { %5748 = vtanh.f32 %v2803_v50  ;;  %v2807_v56 = vadd.f32 %v2806_v54, %v7538_v53  ;;  %v2895_v58 = vpop.f32.mrb[68].mxu1  ;;  %v2808_v59 = vpop.f32.mrb[69].mxu0 }
 0x30c   :  { %5750 = vtanh.f32 %v2892_v52  ;;  %v2896_v61 = vadd.f32 %v2895_v58, %v7538_v53  ;;  %v2809_v38 = vadd.f32 %v2808_v59, %v7538_v53  ;;  %v2897_v62 = vpop.f32.mrb[69].mxu1 }
 0x30d   :  { %5752 = vtanh.f32 %v2807_v56  ;;  %v2898_v57 = vadd.f32 %v2897_v62, %v7538_v53 }
 0x30e   :  { %5754 = vtanh.f32 %v2896_v61  ;;  %v2812_v0 = vpop.f32.mrb[70].mxu0 }
 0x30f   :  { %v5737_v2 = vpop.eup %5736  ;;  %5756 = vtanh.f32 %v2809_v38  ;;  %v2813_v5 = vadd.f32 %v2812_v0, %v7544_v63  ;;  %v2901_v6 = vpop.f32.mrb[70].mxu1 }
 0x310   :  { %v2814_v7 = vpop.f32.mrb[71].mxu0  ;;  %v5739_v60 = vpop.eup %5738  ;;  %5758 = vtanh.f32 %v2898_v57  ;;  %v2902_v8 = vadd.f32 %v2901_v6, %v7544_v63 }
 0x311   :  { %v2815_v9 = vadd.f32 %v2814_v7, %v7544_v63  ;;  %v2903_v10 = vpop.f32.mrb[71].mxu1  ;;  %v5741_v11 = vpop.eup %5740  ;;  %5760 = vtanh.f32 %v2813_v5 }
 0x312   :  { %v2904_v12 = vadd.f32 %v2903_v10, %v7544_v63  ;;  %v5743_v13 = vpop.eup %5742  ;;  %5762 = vtanh.f32 %v2902_v8 }
 0x313   :  { %v5745_v14 = vpop.eup %5744  ;;  %5764 = vtanh.f32 %v2815_v9 }
 0x314   :  { %v5747_v15 = vpop.eup %5746  ;;  %5766 = vtanh.f32 %v2904_v12  ;;  %v5412_v55 = vpack.c.bf16 %v5745_v14, %v5737_v2 }
 0x315   :  { %v5749_v16 = vpop.eup %5748  ;;  %v5420_v17 = vpack.c.bf16 %v5747_v15, %v5739_v60 }
 0x316   :  { %v5751_v45 = vpop.eup %5750  ;;  %v5410_v18 = vpack.c.bf16 %v5749_v16, %v5741_v11 }
 0x317   :  { %v5753_v19 = vpop.eup %5752  ;;  %v5418_v20 = vpack.c.bf16 %v5751_v45, %v5743_v13 }
 0x318   :  { %v5755_v21 = vpop.eup %5754  ;;  %5411 = vmatprep.subr.bf16.mxu0 %v5410_v18 }
 0x319   :  { %v5757_v22 = vpop.eup %5756  ;;  %5419 = vmatprep.subr.bf16.mxu1 %v5418_v20  ;;  %5413 = vmatpush1.bf16.msra.mxu0 %v5412_v55 }
 0x31a   :  { %v5759_v23 = vpop.eup %5758  ;;  %5421 = vmatpush1.bf16.msra.mxu1 %v5420_v17 }
 0x31b   :  { %v5761_v24 = vpop.eup %5760 }
 0x31c   :  { %v5763_v25 = vpop.eup %5762  ;;  %v5416_v26 = vpack.c.bf16 %v5761_v24, %v5753_v19 }
 0x31d   :  { %v5765_v1 = vpop.eup %5764  ;;  %v5424_v27 = vpack.c.bf16 %v5763_v25, %v5755_v21 }
 0x31e   :  { %v5767_v28 = vpop.eup %5766  ;;  %v5414_v3 = vpack.c.bf16 %v5765_v1, %v5757_v22 }
 0x31f   :  { %v5422_v29 = vpack.c.bf16 %v5767_v28, %v5759_v23 }
 0x320   :  { %5415 = vmatprep.subr.bf16.mxu0 %v5414_v3 }
 0x321   :  { %5423 = vmatprep.subr.bf16.mxu1 %v5422_v29  ;;  %5417 = vmatpush1.bf16.msra.mxu0 %v5416_v26 }
 0x322   :  { %5425 = vmatpush1.bf16.msra.mxu1 %v5424_v27 }
 0x324   :  { %4570 = vmatmul.mubr.msk.f32.vlgmr.msra.gmra.mrb[96].mxu0 %vm1897_vm2, %v7553_v30 }
 0x325   :  { %4571 = vmatmul.mubr.msk.f32.vlgmr.msra.gmra.mrb[96].mxu1 %vm1897_vm2, %v7553_v30  ;;  %3716 = vmatprep.mubr.f32.mxu0 %v5890_v4 }
 0x326   :  { %3787 = vmatprep.mubr.f32.mxu1 %v5890_v4 }
 0x343   :  { %v2972_v31 = vpop.f32.mrb[72].mxu0 }
 0x344   :  { %v2973_v32 = vadd.f32 %v2972_v31, %v7526_v34  ;;  %v3061_v35 = vpop.f32.mrb[72].mxu1  ;;  %v2974_v33 = vpop.f32.mrb[73].mxu0 }
 0x345   :  { %v3062_v36 = vadd.f32 %v3061_v35, %v7526_v34  ;;  %v2975_v37 = vadd.f32 %v2974_v33, %v7526_v34  ;;  %v3063_v40 = vpop.f32.mrb[73].mxu1 }
 0x346   :  { %5768 = vtanh.f32 %v2973_v32  ;;  %v3064_v41 = vadd.f32 %v3063_v40, %v7526_v34 }
 0x347   :  { %5770 = vtanh.f32 %v3062_v36  ;;  %v2978_v42 = vpop.f32.mrb[74].mxu0 }
 0x348   :  { %5772 = vtanh.f32 %v2975_v37  ;;  %v2979_v43 = vadd.f32 %v2978_v42, %v7532_v39  ;;  %v3067_v44 = vpop.f32.mrb[74].mxu1  ;;  %v2980_v46 = vpop.f32.mrb[75].mxu0 }
 0x349   :  { %5774 = vtanh.f32 %v3064_v41  ;;  %v3068_v47 = vadd.f32 %v3067_v44, %v7532_v39  ;;  %v2981_v48 = vadd.f32 %v2980_v46, %v7532_v39  ;;  %v3069_v49 = vpop.f32.mrb[75].mxu1 }
 0x34a   :  { %5776 = vtanh.f32 %v2979_v43  ;;  %v3070_v50 = vadd.f32 %v3069_v49, %v7532_v39 }
 0x34b   :  { %5778 = vtanh.f32 %v3068_v47  ;;  %v2984_v51 = vpop.f32.mrb[76].mxu0 }
 0x34c   :  { %5780 = vtanh.f32 %v2981_v48  ;;  %v2985_v52 = vadd.f32 %v2984_v51, %v7538_v53  ;;  %v3073_v54 = vpop.f32.mrb[76].mxu1  ;;  %v2986_v56 = vpop.f32.mrb[77].mxu0 }
 0x34d   :  { %5782 = vtanh.f32 %v3070_v50  ;;  %v3074_v58 = vadd.f32 %v3073_v54, %v7538_v53  ;;  %v2987_v59 = vadd.f32 %v2986_v56, %v7538_v53  ;;  %v3075_v61 = vpop.f32.mrb[77].mxu1 }
 0x34e   :  { %5784 = vtanh.f32 %v2985_v52  ;;  %v3076_v38 = vadd.f32 %v3075_v61, %v7538_v53 }
 0x34f   :  { %5786 = vtanh.f32 %v3074_v58  ;;  %v2990_v62 = vpop.f32.mrb[78].mxu0 }
 0x350   :  { %v5769_v57 = vpop.eup %5768  ;;  %5788 = vtanh.f32 %v2987_v59  ;;  %v2991_v0 = vadd.f32 %v2990_v62, %v7544_v63  ;;  %v3079_v2 = vpop.f32.mrb[78].mxu1 }
 0x351   :  { %v2992_v5 = vpop.f32.mrb[79].mxu0  ;;  %v5771_v6 = vpop.eup %5770  ;;  %5790 = vtanh.f32 %v3076_v38  ;;  %v3080_v7 = vadd.f32 %v3079_v2, %v7544_v63 }
 0x352   :  { %v2993_v60 = vadd.f32 %v2992_v5, %v7544_v63  ;;  %v3081_v8 = vpop.f32.mrb[79].mxu1  ;;  %v5773_v9 = vpop.eup %5772  ;;  %5792 = vtanh.f32 %v2991_v0 }
 0x353   :  { %v3082_v10 = vadd.f32 %v3081_v8, %v7544_v63  ;;  %v5775_v11 = vpop.eup %5774  ;;  %5794 = vtanh.f32 %v3080_v7 }
 0x354   :  { %v5777_v12 = vpop.eup %5776  ;;  %5796 = vtanh.f32 %v2993_v60 }
 0x355   :  { %v5779_v13 = vpop.eup %5778  ;;  %5798 = vtanh.f32 %v3082_v10  ;;  %v5428_v14 = vpack.c.bf16 %v5777_v12, %v5769_v57 }
 0x356   :  { %v5781_v15 = vpop.eup %5780  ;;  %v5436_v55 = vpack.c.bf16 %v5779_v13, %v5771_v6 }
 0x357   :  { %v5783_v16 = vpop.eup %5782  ;;  %v5426_v17 = vpack.c.bf16 %v5781_v15, %v5773_v9 }
 0x358   :  { %v5785_v45 = vpop.eup %5784  ;;  %v5434_v18 = vpack.c.bf16 %v5783_v16, %v5775_v11 }
 0x359   :  { %v5787_v19 = vpop.eup %5786  ;;  %5427 = vmatprep.subr.bf16.mxu0 %v5426_v17 }
 0x35a   :  { %v5789_v20 = vpop.eup %5788  ;;  %5435 = vmatprep.subr.bf16.mxu1 %v5434_v18  ;;  %5429 = vmatpush1.bf16.msra.mxu0 %v5428_v14 }
 0x35b   :  { %v5791_v21 = vpop.eup %5790  ;;  %5437 = vmatpush1.bf16.msra.mxu1 %v5436_v55 }
 0x35c   :  { %v5793_v22 = vpop.eup %5792 }
 0x35d   :  { %v5795_v23 = vpop.eup %5794  ;;  %v5432_v24 = vpack.c.bf16 %v5793_v22, %v5785_v45 }
 0x35e   :  { %v5797_v25 = vpop.eup %5796  ;;  %v5440_v26 = vpack.c.bf16 %v5795_v23, %v5787_v19 }
 0x35f   :  { %v5799_v1 = vpop.eup %5798  ;;  %v5430_v27 = vpack.c.bf16 %v5797_v25, %v5789_v20 }
 0x360   :  { %v5438_v28 = vpack.c.bf16 %v5799_v1, %v5791_v21 }
 0x361   :  { %5431 = vmatprep.subr.bf16.mxu0 %v5430_v27 }
 0x362   :  { %5439 = vmatprep.subr.bf16.mxu1 %v5438_v28  ;;  %5433 = vmatpush1.bf16.msra.mxu0 %v5432_v24 }
 0x363   :  { %5441 = vmatpush1.bf16.msra.mxu1 %v5440_v26 }
 0x365   :  { %4572 = vmatmul.mubr.msk.f32.vlgmr.msra.gmra.mrb[98].mxu0 %vm1897_vm2, %v7553_v30 }
 0x366   :  { %4573 = vmatmul.mubr.msk.f32.vlgmr.msra.gmra.mrb[98].mxu1 %vm1897_vm2, %v7553_v30  ;;  %3858 = vmatprep.mubr.f32.mxu0 %v5890_v4 }
 0x367   :  { %3929 = vmatprep.mubr.f32.mxu1 %v5890_v4 }
 0x383   :  { %v3150_v3 = vpop.f32.mrb[80].mxu0 }
 0x384   :  { %v3151_v29 = vadd.f32 %v3150_v3, %v7526_v34  ;;  %v3239_v31 = vpop.f32.mrb[80].mxu1  ;;  %v3152_v32 = vpop.f32.mrb[81].mxu0 }
 0x385   :  { %v3240_v35 = vadd.f32 %v3239_v31, %v7526_v34  ;;  %v3153_v33 = vadd.f32 %v3152_v32, %v7526_v34  ;;  %v3241_v36 = vpop.f32.mrb[81].mxu1 }
 0x386   :  { %5800 = vtanh.f32 %v3151_v29  ;;  %v3242_v37 = vadd.f32 %v3241_v36, %v7526_v34 }
 0x387   :  { %5802 = vtanh.f32 %v3240_v35  ;;  %v3156_v40 = vpop.f32.mrb[82].mxu0 }
 0x388   :  { %5804 = vtanh.f32 %v3153_v33  ;;  %v3157_v41 = vadd.f32 %v3156_v40, %v7532_v39  ;;  %v3245_v42 = vpop.f32.mrb[82].mxu1  ;;  %v3158_v43 = vpop.f32.mrb[83].mxu0 }
 0x389   :  { %5806 = vtanh.f32 %v3242_v37  ;;  %v3246_v44 = vadd.f32 %v3245_v42, %v7532_v39  ;;  %v3159_v46 = vadd.f32 %v3158_v43, %v7532_v39  ;;  %v3247_v47 = vpop.f32.mrb[83].mxu1 }
 0x38a   :  { %5808 = vtanh.f32 %v3157_v41  ;;  %v3248_v48 = vadd.f32 %v3247_v47, %v7532_v39 }
 0x38b   :  { %5810 = vtanh.f32 %v3246_v44  ;;  %v3162_v49 = vpop.f32.mrb[84].mxu0 }
 0x38c   :  { %5812 = vtanh.f32 %v3159_v46  ;;  %v3163_v50 = vadd.f32 %v3162_v49, %v7538_v53  ;;  %v3251_v51 = vpop.f32.mrb[84].mxu1  ;;  %v3164_v52 = vpop.f32.mrb[85].mxu0 }
 0x38d   :  { %5814 = vtanh.f32 %v3248_v48  ;;  %v3252_v54 = vadd.f32 %v3251_v51, %v7538_v53  ;;  %v3165_v56 = vadd.f32 %v3164_v52, %v7538_v53  ;;  %v3253_v58 = vpop.f32.mrb[85].mxu1 }
 0x38e   :  { %5816 = vtanh.f32 %v3163_v50  ;;  %v3254_v59 = vadd.f32 %v3253_v58, %v7538_v53 }
 0x38f   :  { %5818 = vtanh.f32 %v3252_v54  ;;  %v3168_v61 = vpop.f32.mrb[86].mxu0 }
 0x390   :  { %v5801_v38 = vpop.eup %5800  ;;  %5820 = vtanh.f32 %v3165_v56  ;;  %v3169_v62 = vadd.f32 %v3168_v61, %v7544_v63  ;;  %v3257_v57 = vpop.f32.mrb[86].mxu1 }
 0x391   :  { %v3170_v0 = vpop.f32.mrb[87].mxu0  ;;  %v5803_v2 = vpop.eup %5802  ;;  %5822 = vtanh.f32 %v3254_v59  ;;  %v3258_v5 = vadd.f32 %v3257_v57, %v7544_v63 }
 0x392   :  { %v3171_v6 = vadd.f32 %v3170_v0, %v7544_v63  ;;  %v3259_v7 = vpop.f32.mrb[87].mxu1  ;;  %v5805_v60 = vpop.eup %5804  ;;  %5824 = vtanh.f32 %v3169_v62 }
 0x393   :  { %v3260_v8 = vadd.f32 %v3259_v7, %v7544_v63  ;;  %v5807_v9 = vpop.eup %5806  ;;  %5826 = vtanh.f32 %v3258_v5 }
 0x394   :  { %v5809_v10 = vpop.eup %5808  ;;  %5828 = vtanh.f32 %v3171_v6 }
 0x395   :  { %v5811_v11 = vpop.eup %5810  ;;  %5830 = vtanh.f32 %v3260_v8  ;;  %v5444_v12 = vpack.c.bf16 %v5809_v10, %v5801_v38 }
 0x396   :  { %v5813_v13 = vpop.eup %5812  ;;  %v5452_v14 = vpack.c.bf16 %v5811_v11, %v5803_v2 }
 0x397   :  { %v5815_v15 = vpop.eup %5814  ;;  %v5442_v55 = vpack.c.bf16 %v5813_v13, %v5805_v60 }
 0x398   :  { %v5817_v16 = vpop.eup %5816  ;;  %v5450_v17 = vpack.c.bf16 %v5815_v15, %v5807_v9 }
 0x399   :  { %v5819_v45 = vpop.eup %5818  ;;  %5443 = vmatprep.subr.bf16.mxu0 %v5442_v55 }
 0x39a   :  { %v5821_v18 = vpop.eup %5820  ;;  %5451 = vmatprep.subr.bf16.mxu1 %v5450_v17  ;;  %5445 = vmatpush1.bf16.msra.mxu0 %v5444_v12 }
 0x39b   :  { %v5823_v19 = vpop.eup %5822  ;;  %5453 = vmatpush1.bf16.msra.mxu1 %v5452_v14 }
 0x39c   :  { %v5825_v20 = vpop.eup %5824 }
 0x39d   :  { %v5827_v21 = vpop.eup %5826  ;;  %v5448_v22 = vpack.c.bf16 %v5825_v20, %v5817_v16 }
 0x39e   :  { %v5829_v23 = vpop.eup %5828  ;;  %v5456_v24 = vpack.c.bf16 %v5827_v21, %v5819_v45  ;;  %v5891_v21 = vmov 1966171168  }
 0x39f   :  { %v5831_v25 = vpop.eup %5830  ;;  %v5446_v26 = vpack.c.bf16 %v5829_v23, %v5821_v18  ;;  %v4101_v23 = vlaneseq }
 0x3a0   :  { %v5454_v1 = vpack.c.bf16 %v5831_v25, %v5823_v19 }
 0x3a1   :  { %5447 = vmatprep.subr.bf16.mxu0 %v5446_v26  ;;  %v4102_v26 = vshrl.u32 %v4101_v23, 7 }
 0x3a2   :  { %5455 = vmatprep.subr.bf16.mxu1 %v5454_v1  ;;  %5449 = vmatpush1.bf16.msra.mxu0 %v5448_v22  ;;  %v4099_v22 = vunpack.c.l.s4 %v5891_v21 }
 0x3a3   :  { %5457 = vmatpush1.bf16.msra.mxu1 %v5456_v24  ;;  %v3506_v24 = vstv %s7646_s6  ;;  %s5892_s6 = smov [#allocation3]  }
 0x3a4   :  { %v4100_v25 = vunpack.c.0.s8 %v4099_v22  ;;  %s4202_s4 = sshll.u32 %s5892_s6, 4  ;;  %s4203_s4 = int_to_ptr.vmem [resolvable:$true] %s4202_s4 }
 0x3a5   :  { %4574 = vmatmul.mubr.msk.f32.vlgmr.msra.gmra.mrb[100].mxu0 %vm1897_vm2, %v7553_v30  ;;  %s5865_s2 = scalar_lea.vmem %s4203_s4, 256  ;;  %p5870_p1 = scmp.lt.s32.totalorder %s4203_s4, %s4203_s4 }
 0x3a6   :  { %4575 = vmatmul.mubr.msk.f32.vlgmr.msra.gmra.mrb[100].mxu1 %vm1897_vm2, %v7553_v30  ;;  %4000 = vmatprep.mubr.f32.mxu0 %v5890_v4  ;;  %p5866_p0 = scmp.ne.s32.totalorder %s4203_s4, %s5865_s2  ;;  %p5871_p2 = scmp.lt.s32.totalorder %s5865_s2, %s5865_s2 }
 0x3a7   :  { %4071 = vmatprep.mubr.f32.mxu1 %v5890_v4 }
 0x3a8   :  { %p5872_p3 = por %p5871_p2, %p5870_p1 }
 0x3aa   :  { %p5873_p4 = pnand %p5872_p3, %p5866_p0 }
 0x3c3   :  { %v3328_v27 = vpop.f32.mrb[88].mxu0 }
 0x3c4   :  { %v3329_v28 = vadd.f32 %v3328_v27, %v7526_v34  ;;  %v3417_v3 = vpop.f32.mrb[88].mxu1  ;;  %v3330_v29 = vpop.f32.mrb[89].mxu0 }
 0x3c5   :  { %v3418_v31 = vadd.f32 %v3417_v3, %v7526_v34  ;;  %v3331_v32 = vadd.f32 %v3330_v29, %v7526_v34  ;;  %v3419_v35 = vpop.f32.mrb[89].mxu1 }
 0x3c6   :  { %5832 = vtanh.f32 %v3329_v28  ;;  %v3420_v33 = vadd.f32 %v3419_v35, %v7526_v34 }
 0x3c7   :  { %5834 = vtanh.f32 %v3418_v31  ;;  %v3334_v36 = vpop.f32.mrb[90].mxu0 }
 0x3c8   :  { %5836 = vtanh.f32 %v3331_v32  ;;  %v3335_v37 = vadd.f32 %v3334_v36, %v7532_v39  ;;  %v3423_v40 = vpop.f32.mrb[90].mxu1  ;;  %v3336_v4 = vpop.f32.mrb[91].mxu0  ;;  %v4103_v32 = vsub.s32 %v4100_v25, %v4102_v26 }
 0x3c9   :  { %5838 = vtanh.f32 %v3420_v33  ;;  %v3424_v41 = vadd.f32 %v3423_v40, %v7532_v39  ;;  %v3337_v42 = vadd.f32 %v3336_v4, %v7532_v39  ;;  %v3425_v43 = vpop.f32.mrb[91].mxu1 }
 0x3ca   :  { %5840 = vtanh.f32 %v3335_v37  ;;  %v3426_v44 = vadd.f32 %v3425_v43, %v7532_v39 }
 0x3cb   :  { %5842 = vtanh.f32 %v3424_v41  ;;  %v3340_v46 = vpop.f32.mrb[92].mxu0 }
 0x3cc   :  { %5844 = vtanh.f32 %v3337_v42  ;;  %v3341_v34 = vadd.f32 %v3340_v46, %v7538_v53  ;;  %v3429_v47 = vpop.f32.mrb[92].mxu1  ;;  %v3342_v48 = vpop.f32.mrb[93].mxu0 }
 0x3cd   :  { %5846 = vtanh.f32 %v3426_v44  ;;  %v3430_v49 = vadd.f32 %v3429_v47, %v7538_v53  ;;  %v3343_v50 = vadd.f32 %v3342_v48, %v7538_v53  ;;  %v3431_v51 = vpop.f32.mrb[93].mxu1 }
 0x3ce   :  { %5848 = vtanh.f32 %v3341_v34  ;;  %v3432_v52 = vadd.f32 %v3431_v51, %v7538_v53 }
 0x3cf   :  { %5850 = vtanh.f32 %v3430_v49  ;;  %v3346_v54 = vpop.f32.mrb[94].mxu0 }
 0x3d0   :  { %v5833_v56 = vpop.eup %5832  ;;  %5852 = vtanh.f32 %v3343_v50  ;;  %v3347_v39 = vadd.f32 %v3346_v54, %v7544_v63  ;;  %v3435_v58 = vpop.f32.mrb[94].mxu1 }
 0x3d1   :  { %v3348_v59 = vpop.f32.mrb[95].mxu0  ;;  %v5835_v61 = vpop.eup %5834  ;;  %5854 = vtanh.f32 %v3432_v52  ;;  %v3436_v38 = vadd.f32 %v3435_v58, %v7544_v63 }
 0x3d2   :  { %v3349_v62 = vadd.f32 %v3348_v59, %v7544_v63  ;;  %v3437_v57 = vpop.f32.mrb[95].mxu1  ;;  %v5837_v0 = vpop.eup %5836  ;;  %5856 = vtanh.f32 %v3347_v39 }
 0x3d3   :  { %v3438_v2 = vadd.f32 %v3437_v57, %v7544_v63  ;;  %v5839_v53 = vpop.eup %5838  ;;  %5858 = vtanh.f32 %v3436_v38 }
 0x3d4   :  { %v5841_v5 = vpop.eup %5840  ;;  %5860 = vtanh.f32 %v3349_v62 }
 0x3d5   :  { %v5843_v6 = vpop.eup %5842  ;;  %5862 = vtanh.f32 %v3438_v2  ;;  %v5460_v7 = vpack.c.bf16 %v5841_v5, %v5833_v56 }
 0x3d6   :  { %v5845_v60 = vpop.eup %5844  ;;  %v5468_v8 = vpack.c.bf16 %v5843_v6, %v5835_v61 }
 0x3d7   :  { %v5847_v9 = vpop.eup %5846  ;;  %v5458_v10 = vpack.c.bf16 %v5845_v60, %v5837_v0 }
 0x3d8   :  { %v5849_v11 = vpop.eup %5848  ;;  %v5466_v12 = vpack.c.bf16 %v5847_v9, %v5839_v53 }
 0x3d9   :  { %v5851_v13 = vpop.eup %5850  ;;  %5459 = vmatprep.subr.bf16.mxu0 %v5458_v10 }
 0x3da   :  { %v5853_v14 = vpop.eup %5852  ;;  %5467 = vmatprep.subr.bf16.mxu1 %v5466_v12  ;;  %5461 = vmatpush1.bf16.msra.mxu0 %v5460_v7 }
 0x3db   :  { %v5855_v15 = vpop.eup %5854  ;;  %5469 = vmatpush1.bf16.msra.mxu1 %v5468_v8 }
 0x3dc   :  { %v5857_v63 = vpop.eup %5856 }
 0x3dd   :  { %v5859_v55 = vpop.eup %5858  ;;  %v5464_v16 = vpack.c.bf16 %v5857_v63, %v5849_v11 }
 0x3de   :  { %v5861_v17 = vpop.eup %5860  ;;  %v5472_v45 = vpack.c.bf16 %v5859_v55, %v5851_v13 }
 0x3df   :  { %v5863_v18 = vpop.eup %5862  ;;  %v5462_v19 = vpack.c.bf16 %v5861_v17, %v5853_v14 }
 0x3e0   :  { %v5470_v20 = vpack.c.bf16 %v5863_v18, %v5855_v15 }
 0x3e1   :  { %5463 = vmatprep.subr.bf16.mxu0 %v5462_v19 }
 0x3e2   :  { %5471 = vmatprep.subr.bf16.mxu1 %v5470_v20  ;;  %5465 = vmatpush1.bf16.msra.mxu0 %v5464_v16 }
 0x3e3   :  { %5473 = vmatpush1.bf16.msra.mxu1 %v5472_v45 }
 0x3e5   :  { %4576 = vmatmul.mubr.msk.f32.vlgmr.msra.gmra.mrb[102].mxu0 %vm1897_vm2, %v7553_v30 }
 0x3e6   :  { %4577 = vmatmul.mubr.msk.f32.vlgmr.msra.gmra.mrb[102].mxu1 %vm1897_vm2, %v7553_v30 }
 0x3f7   :  { %v3576_v1 = vpop.f32.mrb[96].mxu0 }
 0x3f8   :  { %v3577_v27 = vadd.f32 %v3576_v1, %v3506_v24  ;;  %v3647_v28 = vpop.f32.mrb[96].mxu1  ;;  %v3578_v3 = vpop.f32.mrb[97].mxu0 }
 0x3f9   :  { %v3648_v29 = vadd.f32 %v3647_v28, %v3506_v24  ;;  %v3579_v31 = vadd.f32 %v3578_v3, %v3506_v24  ;;  %v3649_v35 = vpop.f32.mrb[97].mxu1 }
 0x3fa   :  { %v3650_v33 = vadd.f32 %v3649_v35, %v3506_v24 }
 0x3fb   :  { %v4094_v36 = vcombine.low %v3577_v27, %v3579_v31 }
 0x3fc   :  { %v4095_v30 = vcombine.low %v3648_v29, %v3650_v33 }
 0x3fd   :  { %v4104_v37 = vrot.slane %v4094_v36, %v4103_v32 }
 0x3fe   :  { %v4111_v40 = vrot.slane %v4095_v30, %v4103_v32 }
 0x400   :  { %v4126_v4 = vcombine.low %v4104_v37, %v4111_v40 }
 0x402   :  { %v4134_v56 = vrot.slane %v4126_v4, %v4103_v32 }
 0x438   :  { %v3718_v41 = vpop.f32.mrb[98].mxu0 }
 0x439   :  { %v3719_v42 = vadd.f32 %v3718_v41, %v3506_v24  ;;  %v3789_v43 = vpop.f32.mrb[98].mxu1  ;;  %v3720_v44 = vpop.f32.mrb[99].mxu0 }
 0x43a   :  { %v3790_v46 = vadd.f32 %v3789_v43, %v3506_v24  ;;  %v3721_v34 = vadd.f32 %v3720_v44, %v3506_v24  ;;  %v3791_v47 = vpop.f32.mrb[99].mxu1 }
 0x43b   :  { %v3792_v48 = vadd.f32 %v3791_v47, %v3506_v24 }
 0x43c   :  { %v4096_v49 = vcombine.low %v3719_v42, %v3721_v34 }
 0x43d   :  { %v4097_v50 = vcombine.low %v3790_v46, %v3792_v48 }
 0x43e   :  { %v4118_v51 = vrot.slane %v4096_v49, %v4103_v32 }
 0x43f   :  { %v4125_v52 = vrot.slane %v4097_v50, %v4103_v32 }
 0x441   :  { %v4127_v54 = vcombine.low %v4118_v51, %v4125_v52 }
 0x443   :  { %v4141_v39 = vrot.slane %v4127_v54, %v4103_v32 }
 0x445   :  { %v4142_v58 = vcombine.low %v4134_v56, %v4141_v39 }
 0x447   :  { %4194 = vst [vmem:[#allocation3] sm:$0xff] %v4142_v58 }
 0x478   :  { %v3860_v59 = vpop.f32.mrb[100].mxu0 }
 0x479   :  { %v3861_v61 = vadd.f32 %v3860_v59, %v3506_v24  ;;  %v3931_v38 = vpop.f32.mrb[100].mxu1  ;;  %v3862_v62 = vpop.f32.mrb[101].mxu0 }
 0x47a   :  { %v3932_v57 = vadd.f32 %v3931_v38, %v3506_v24  ;;  %v3863_v0 = vadd.f32 %v3862_v62, %v3506_v24  ;;  %v3933_v2 = vpop.f32.mrb[101].mxu1 }
 0x47b   :  { %v3934_v53 = vadd.f32 %v3933_v2, %v3506_v24 }
 0x47c   :  { %v4143_v5 = vcombine.low %v3861_v61, %v3863_v0 }
 0x47d   :  { %v4144_v6 = vcombine.low %v3932_v57, %v3934_v53 }
 0x47e   :  { %v4153_v7 = vrot.slane %v4143_v5, %v4103_v32 }
 0x47f   :  { %v4160_v60 = vrot.slane %v4144_v6, %v4103_v32 }
 0x481   :  { %v4175_v8 = vcombine.low %v4153_v7, %v4160_v60 }
 0x483   :  { %v4183_v19 = vrot.slane %v4175_v8, %v4103_v32 }
 0x4b8   :  { %v4002_v9 = vpop.f32.mrb[102].mxu0 }
 0x4b9   :  { %v4003_v10 = vadd.f32 %v4002_v9, %v3506_v24  ;;  %v4073_v11 = vpop.f32.mrb[102].mxu1  ;;  %v4004_v12 = vpop.f32.mrb[103].mxu0 }
 0x4ba   :  { %v4074_v13 = vadd.f32 %v4073_v11, %v3506_v24  ;;  %v4005_v14 = vadd.f32 %v4004_v12, %v3506_v24  ;;  %v4075_v15 = vpop.f32.mrb[103].mxu1 }
 0x4bb   :  { %v4076_v63 = vadd.f32 %v4075_v15, %v3506_v24 }
 0x4bc   :  { %v4145_v55 = vcombine.low %v4003_v10, %v4005_v14 }
 0x4bd   :  { %v4146_v16 = vcombine.low %v4074_v13, %v4076_v63 }
 0x4be   :  { %v4167_v17 = vrot.slane %v4145_v55, %v4103_v32 }
 0x4bf   :  { %v4174_v45 = vrot.slane %v4146_v16, %v4103_v32 }
 0x4c1   :  { %v4176_v18 = vcombine.low %v4167_v17, %v4174_v45 }
 0x4c3   :  { %v4190_v20 = vrot.slane %v4176_v18, %v4103_v32 }
 0x4c5   :  { %v4191_v21 = vcombine.low %v4183_v19, %v4190_v20 }
 0x4c7   :  { %4195 = vst [vmem:[#allocation3 + $0x8] sm:$0xff] %v4191_v21 }
 0x4c8   :  { %5876 = shalt.err (!%p5873_p4)
}
 0x4c9   :  { %s5877_s13 = scalar_lea.hbm %s7647_s7, 256 }
 0x4ca   :  { %p5878_p5 = scmp.ne.s32.totalorder %s7647_s7, %s5877_s13  ;;  %p5881_p6 = scmp.lt.u32.totalorder %s5877_s13, %s7647_s7 }
 0x4cc   :  { %p5883_p7 = pnand %p5881_p6, %p5878_p5 }
 0x4ce   :  { %5886 = shalt.err (!%p5883_p7)
}
 0x4cf   :  { %4205 = dma.vmem_to_hbm [thread:$0]  %s4203_s4, 256, %s7647_s7, [#allocation4]  }
 0x4d0   :  { %5887 = dma.done.wait [#allocation4], 256  }
 0x4d1   :  { %5888 = vsyncadd [#allocation4], 4294967040 }
 0x4d2   :  { %4209 = vsyncpa [#allocation4], 1 }

</bundles_post_ra>
